<compile_context>
chip_gen: v7x
topology: tpu7x:2x2x1
jax: 0.10.0
libtpu: 0.0.40
codegen_flags: <defaults>
</compile_context>

<pallas_src>
import jax
import jax.numpy as jnp
from jax.experimental import pallas as pl
from jax.experimental.pallas import tpu as pltpu


def _silu(v):
    # DimeNet activation (swish / SiLU), kept in f32 on all generations.
    return v * jax.nn.sigmoid(v)


def interaction_kernel(
    # tensor inputs (VMEM blocks)
    idxkj_ref, idxji_ref,
    x_ref, rbf_ref, sbf_ref,
    w_rbf_ref, w_sbf_rep_ref,
    w_ji_ref, b_ji_ref, w_kj_ref, b_kj_ref,
    w_bilf_ref,
    bs_w1_ref, bs_b1_ref, bs_w2_ref, bs_b2_ref,
    w_lin_ref, b_lin_ref,
    as_w1_ref, as_b1_ref, as_w2_ref, as_b2_ref,
    # output
    out_ref,
    # scratch (persist across the triplet-tile grid)
    xkj_scr, acc_scr,
):
    f32, bf16 = jnp.float32, jnp.bfloat16
    step = pl.program_id(0)
    E, BH = xkj_scr.shape
    H = acc_scr.shape[1]
    B = BH // H
    TT = sbf_ref.shape[0]

    # ---- step 0: edge-phase linears; seed the scatter accumulator with x_ji. ----
    @pl.when(step == 0)
    def _():
        x_b = x_ref[...].astype(bf16)
        rbf_p = jnp.dot(rbf_ref[...], w_rbf_ref[...], preferred_element_type=f32)
        x_ji = _silu(jnp.dot(x_b, w_ji_ref[...], preferred_element_type=f32)
                     + b_ji_ref[...])
        x_kj = _silu(jnp.dot(x_b, w_kj_ref[...], preferred_element_type=f32)
                     + b_kj_ref[...]) * rbf_p
        # Tile x_kj B times along lanes ONCE so every triplet tile's one-hot gather
        # matmul emits the already-tiled [TT, B*H] operand (no per-step relayout).
        xkj_scr[...] = jnp.concatenate([x_kj] * B, axis=1)
        acc_scr[...] = x_ji        # accumulator starts at x_ji; messages add onto it

    # ---- every step: one triplet tile -> bilinear messages -> one-hot scatter. ----
    # sbf_rep[w, j*H + l] = (sbf @ W_sbf)[w, j]   (W_sbf columns repeated H times on host)
    sbf_rep = jnp.dot(sbf_ref[...], w_sbf_rep_ref[...],
                      preferred_element_type=f32)                       # [TT, B*H] f32

    # One-hot gather via the MXU (replaces TT dynamic-row copies).
    idx_kj = idxkj_ref[...]                                             # [TT, 1] int32
    gather_oh = (idx_kj ==
                 jax.lax.broadcasted_iota(jnp.int32, (TT, E), 1)).astype(f32)
    xg_tiled = jnp.dot(gather_oh, xkj_scr[...],
                       preferred_element_type=f32)                      # [TT, B*H] f32

    # Fused bilinear: z[w, j*H+l] = sbf_p[w,j] * x_kj[idx_kj[w], l]  (one VPU mul),
    # then a single [TT, B*H] @ [B*H, H] bf16 MXU matmul with f32 accumulation.
    z = (sbf_rep * xg_tiled).astype(bf16)
    m = jnp.dot(z, w_bilf_ref[...], preferred_element_type=f32)         # [TT, H] f32

    # One-hot scatter-add via the MXU (replaces the serialized RMW loop; duplicate
    # idx_ji within a tile are summed correctly by the contraction).
    idx_ji = idxji_ref[...]                                             # [1, TT] int32
    scatter_oh = (jax.lax.broadcasted_iota(jnp.int32, (E, TT), 0)
                  == idx_ji).astype(f32)                                # [E, TT]
    acc_scr[...] = acc_scr[...] + jnp.dot(scatter_oh, m,
                                          preferred_element_type=f32)   # [E, H]

    # ---- last step: residual MLPs + skip connection, write the output. ----
    # (Runs as tail work; fine at toy sizes -- see TODO above for production.)
    @pl.when(step == pl.num_programs(0) - 1)
    def _():
        h = acc_scr[...]                                                # x_ji + scatter
        for i in range(bs_w1_ref.shape[0]):
            u = _silu(jnp.dot(h.astype(bf16), bs_w1_ref[i],
                              preferred_element_type=f32) + bs_b1_ref[i])
            h = h + _silu(jnp.dot(u.astype(bf16), bs_w2_ref[i],
                                  preferred_element_type=f32) + bs_b2_ref[i])
        h = _silu(jnp.dot(h.astype(bf16), w_lin_ref[...],
                          preferred_element_type=f32) + b_lin_ref[...]) + x_ref[...]
        for i in range(as_w1_ref.shape[0]):
            u = _silu(jnp.dot(h.astype(bf16), as_w1_ref[i],
                              preferred_element_type=f32) + as_b1_ref[i])
            h = h + _silu(jnp.dot(u.astype(bf16), as_w2_ref[i],
                                  preferred_element_type=f32) + as_b2_ref[i])
        out_ref[...] = h


def interaction_block(x, rbf, sbf, idx_kj, idx_ji, params, *, triplet_tile=128):
    """Pallas wrapper: triplet-tiled grid, index tiles in VMEM, one-hot MXU gather/scatter."""
    f32, bf16 = jnp.float32, jnp.bfloat16
    E, H = x.shape
    T, SR = sbf.shape
    R = rbf.shape[1]
    B = params["w_sbf"].shape[1]
    Lb = params["bs_w1"].shape[0]
    La = params["as_w1"].shape[0]

    TT = triplet_tile
    assert TT % 128 == 0, "triplet tile must be a multiple of 128 (lane width of the (1,TT) idx block)"
    num_tiles = -(-T // TT)
    T_pad = num_tiles * TT
    pad = T_pad - T
    # zero-padded sbf rows -> exactly-zero messages, so padded idx entries (0) are no-ops.
    sbf_pad = jnp.pad(sbf, ((0, pad), (0, 0))).astype(f32)
    idx_kj_col = jnp.pad(idx_kj.astype(jnp.int32), (0, pad)).reshape(T_pad, 1)
    idx_ji_row = jnp.pad(idx_ji.astype(jnp.int32), (0, pad)).reshape(1, T_pad)

    # Flatten W from the PyTorch layout [H_i, B, H_l] ('ijl') to [B*H_l, H_i] so the
    # bilinear becomes one matmul; repeat W_sbf columns H times so sbf @ W_sbf_rep
    # directly produces sbf_rep[w, j*H+l] = sbf_p[w, j] (no in-kernel repeat/reshape).
    w_bilf = jnp.transpose(params["w_bil"], (1, 2, 0)).reshape(B * H, H)
    w_sbf_rep = jnp.repeat(params["w_sbf"], H, axis=1)                    # [SR, B*H]
    cast = lambda a: a.astype(bf16)

    tensor_args = (
        idx_kj_col, idx_ji_row,
        x.astype(f32),
        rbf.astype(f32), sbf_pad,
        params["w_rbf"].astype(f32), w_sbf_rep.astype(f32),
        cast(params["w_ji"]), params["b_ji"].astype(f32),
        cast(params["w_kj"]), params["b_kj"].astype(f32),
        cast(w_bilf),
        cast(params["bs_w1"]), params["bs_b1"].astype(f32),
        cast(params["bs_w2"]), params["bs_b2"].astype(f32),
        cast(params["w_lin"]), params["b_lin"].astype(f32),
        cast(params["as_w1"]), params["as_b1"].astype(f32),
        cast(params["as_w2"]), params["as_b2"].astype(f32),
    )

    def full(shape):
        return pl.BlockSpec(shape, lambda i, _n=len(shape): (0,) * _n)

    in_specs = [
        pl.BlockSpec((TT, 1), lambda i: (i, 0)),              # idx_kj column (gather one-hot)
        pl.BlockSpec((1, TT), lambda i: (0, i)),              # idx_ji row    (scatter one-hot)
        full((E, H)),                                         # x (f32, kept for the skip)
        full((E, R)),                                         # rbf
        pl.BlockSpec((TT, SR), lambda i: (i, 0)),             # sbf, tiled over triplets
        full((R, H)), full((SR, B * H)),                      # lin_rbf / lin_sbf (col-repeated)
        full((H, H)), full((1, H)),                           # lin_ji
        full((H, H)), full((1, H)),                           # lin_kj
        full((B * H, H)),                                     # W (flattened bilinear)
        full((Lb, H, H)), full((Lb, 1, H)),                   # before-skip residuals
        full((Lb, H, H)), full((Lb, 1, H)),
        full((H, H)), full((1, H)),                           # lin (skip)
        full((La, H, H)), full((La, 1, H)),                   # after-skip residuals
        full((La, H, H)), full((La, 1, H)),
    ]

    grid_spec = pltpu.PrefetchScalarGridSpec(
        num_scalar_prefetch=0,
        grid=(num_tiles,),
        in_specs=in_specs,
        out_specs=pl.BlockSpec((E, H), lambda i: (0, 0)),
        scratch_shapes=[
            pltpu.VMEM((E, B * H), f32),   # x_kj tiled B times along lanes (gather source)
            pltpu.VMEM((E, H), f32),       # scatter accumulator (x_ji + sum of messages)
        ],
    )

    # Triplet axis carries the scatter accumulator and the last-step output write
    # -> must stay "arbitrary" (never "parallel").
    return pl.pallas_call(
        interaction_kernel,
        out_shape=jax.ShapeDtypeStruct((E, H), f32),
        grid_spec=grid_spec,
        compiler_params=pltpu.CompilerParams(dimension_semantics=("arbitrary",)),
    )(*tensor_args)


def reference(x, rbf_in, sbf_in, idx_kj, idx_ji, p):
    """Pure-JAX (f32) reference matching the PyTorch forward semantics."""
    E = x.shape[0]
    rbf = rbf_in @ p["w_rbf"]
    sbf = sbf_in @ p["w_sbf"]
    x_ji = _silu(x @ p["w_ji"] + p["b_ji"])
    x_kj = _silu(x @ p["w_kj"] + p["b_kj"]) * rbf
    xg = x_kj[idx_kj]                                            # [T, H]
    # torch.einsum('wj,wl,ijl->wi', sbf, x_kj[idx_kj], W) with W in [H_i, B, H_l]
    m = jnp.einsum("wj,wl,ijl->wi", sbf, xg, p["w_bil"])
    sc = jax.ops.segment_sum(m, idx_ji, num_segments=E)
    h = x_ji + sc
    for i in range(p["bs_w1"].shape[0]):
        h = h + _silu(_silu(h @ p["bs_w1"][i] + p["bs_b1"][i]) @ p["bs_w2"][i] + p["bs_b2"][i])
    h = _silu(h @ p["w_lin"] + p["b_lin"]) + x
    for i in range(p["as_w1"].shape[0]):
        h = h + _silu(_silu(h @ p["as_w1"][i] + p["as_b1"][i]) @ p["as_w2"][i] + p["as_b2"][i])
    return h


if __name__ == "__main__":
    # Small, module-consistent shapes.
    H = 32            # hidden_channels
    B = 8             # num_bilinear
    S, R = 4, 8       # num_spherical, num_radial  (S*R = 32)
    Lb, La = 1, 2     # num_before_skip, num_after_skip
    E, T = 16, 32     # num edges, num triplets

    key = jax.random.PRNGKey(0)
    ks = iter(jax.random.split(key, 32))

    def glorot(k, shape, scale=2.0):
        # deterministic stand-in for glorot_orthogonal (same scale convention)
        fan_in, fan_out = shape[-2], shape[-1]
        std = (scale / (fan_in + fan_out)) ** 0.5
        return jax.random.normal(k, shape, jnp.float32) * std

    params = {
        "w_rbf": glorot(next(ks), (R, H)),
        "w_sbf": glorot(next(ks), (S * R, B)),
        "w_ji":  glorot(next(ks), (H, H)), "b_ji": jnp.zeros((1, H), jnp.float32),
        "w_kj":  glorot(next(ks), (H, H)), "b_kj": jnp.zeros((1, H), jnp.float32),
        # PyTorch layout: W is [hidden, num_bilinear, hidden] = [H_i, B, H_l],
        # init N(0, 2 / hidden) exactly like InteractionBlock.reset_parameters.
        "w_bil": jax.random.normal(next(ks), (H, B, H), jnp.float32) * (2.0 / H),
        "bs_w1": glorot(next(ks), (Lb, H, H)), "bs_b1": jnp.zeros((Lb, 1, H), jnp.float32),
        "bs_w2": glorot(next(ks), (Lb, H, H)), "bs_b2": jnp.zeros((Lb, 1, H), jnp.float32),
        "w_lin": glorot(next(ks), (H, H)), "b_lin": jnp.zeros((1, H), jnp.float32),
        "as_w1": glorot(next(ks), (La, H, H)), "as_b1": jnp.zeros((La, 1, H), jnp.float32),
        "as_w2": glorot(next(ks), (La, H, H)), "as_b2": jnp.zeros((La, 1, H), jnp.float32),
    }

    x = jax.random.normal(next(ks), (E, H), jnp.float32)
    rbf_in = jax.random.normal(next(ks), (E, R), jnp.float32)
    sbf_in = jax.random.normal(next(ks), (T, S * R), jnp.float32)
    idx_kj = jax.random.randint(next(ks), (T,), 0, E, jnp.int32)
    idx_ji = jax.random.randint(next(ks), (T,), 0, E, jnp.int32)

    out = interaction_block(x, rbf_in, sbf_in, idx_kj, idx_ji, params, triplet_tile=128)
    out = jax.block_until_ready(out)

    ref = reference(x, rbf_in, sbf_in, idx_kj, idx_ji, params)
    ref = jax.block_until_ready(ref)

    assert out.shape == (E, H) and out.dtype == jnp.float32
    # bf16 MXU operands (f32 accumulation) on the dense linears -> loosened tolerance;
    # the one-hot gather/scatter matmuls are exact (multiplication by 0/1 only).
    assert jnp.allclose(out, ref, atol=5e-2, rtol=5e-2), "mismatch vs pure-JAX reference"
    print("KERNEL_OK")
</pallas_src>

<mosaic_0001>
module attributes {stable_mosaic.version = 11 : i64} {
  func.func @interaction_kernel(%arg0: i32, %arg1: memref<128x1xi32, #tpu.memory_space<vmem>>, %arg2: memref<1x128xi32, #tpu.memory_space<vmem>>, %arg3: memref<16x32xf32, #tpu.memory_space<vmem>>, %arg4: memref<16x8xf32, #tpu.memory_space<vmem>>, %arg5: memref<128x32xf32, #tpu.memory_space<vmem>>, %arg6: memref<8x32xf32, #tpu.memory_space<vmem>>, %arg7: memref<32x256xf32, #tpu.memory_space<vmem>>, %arg8: memref<32x32xbf16, #tpu.memory_space<vmem>>, %arg9: memref<1x32xf32, #tpu.memory_space<vmem>>, %arg10: memref<32x32xbf16, #tpu.memory_space<vmem>>, %arg11: memref<1x32xf32, #tpu.memory_space<vmem>>, %arg12: memref<256x32xbf16, #tpu.memory_space<vmem>>, %arg13: memref<1x32x32xbf16, #tpu.memory_space<vmem>>, %arg14: memref<1x1x32xf32, #tpu.memory_space<vmem>>, %arg15: memref<1x32x32xbf16, #tpu.memory_space<vmem>>, %arg16: memref<1x1x32xf32, #tpu.memory_space<vmem>>, %arg17: memref<32x32xbf16, #tpu.memory_space<vmem>>, %arg18: memref<1x32xf32, #tpu.memory_space<vmem>>, %arg19: memref<2x32x32xbf16, #tpu.memory_space<vmem>>, %arg20: memref<2x1x32xf32, #tpu.memory_space<vmem>>, %arg21: memref<2x32x32xbf16, #tpu.memory_space<vmem>>, %arg22: memref<2x1x32xf32, #tpu.memory_space<vmem>>, %arg23: memref<16x32xf32, #tpu.memory_space<vmem>>, %arg24: memref<16x256xf32, #tpu.memory_space<vmem>>, %arg25: memref<16x32xf32, #tpu.memory_space<vmem>>) attributes {dimension_semantics = [#tpu.dimension_semantics<arbitrary>], iteration_bounds = array<i64: 1>, scalar_prefetch = 0 : i64, scratch_operands = 2 : i64, tpu.core_type = #tpu.core_type<tc>, window_params = [{transform_indices = @transform_0, window_bounds = array<i64: 128, 1>}, {transform_indices = @transform_1, window_bounds = array<i64: 1, 128>}, {pipeline_mode = #tpu.pipeline_mode<synchronous>, transform_indices = @transform_2, window_bounds = array<i64: 16, 32>}, {pipeline_mode = #tpu.pipeline_mode<synchronous>, transform_indices = @transform_3, window_bounds = array<i64: 16, 8>}, {transform_indices = @transform_4, window_bounds = array<i64: 128, 32>}, {pipeline_mode = #tpu.pipeline_mode<synchronous>, transform_indices = @transform_5, window_bounds = array<i64: 8, 32>}, {pipeline_mode = #tpu.pipeline_mode<synchronous>, transform_indices = @transform_6, window_bounds = array<i64: 32, 256>}, {pipeline_mode = #tpu.pipeline_mode<synchronous>, transform_indices = @transform_7, window_bounds = array<i64: 32, 32>}, {pipeline_mode = #tpu.pipeline_mode<synchronous>, transform_indices = @transform_8, window_bounds = array<i64: 1, 32>}, {pipeline_mode = #tpu.pipeline_mode<synchronous>, transform_indices = @transform_9, window_bounds = array<i64: 32, 32>}, {pipeline_mode = #tpu.pipeline_mode<synchronous>, transform_indices = @transform_10, window_bounds = array<i64: 1, 32>}, {pipeline_mode = #tpu.pipeline_mode<synchronous>, transform_indices = @transform_11, window_bounds = array<i64: 256, 32>}, {pipeline_mode = #tpu.pipeline_mode<synchronous>, transform_indices = @transform_12, window_bounds = array<i64: 1, 32, 32>}, {pipeline_mode = #tpu.pipeline_mode<synchronous>, transform_indices = @transform_13, window_bounds = array<i64: 1, 1, 32>}, {pipeline_mode = #tpu.pipeline_mode<synchronous>, transform_indices = @transform_14, window_bounds = array<i64: 1, 32, 32>}, {pipeline_mode = #tpu.pipeline_mode<synchronous>, transform_indices = @transform_15, window_bounds = array<i64: 1, 1, 32>}, {pipeline_mode = #tpu.pipeline_mode<synchronous>, transform_indices = @transform_16, window_bounds = array<i64: 32, 32>}, {pipeline_mode = #tpu.pipeline_mode<synchronous>, transform_indices = @transform_17, window_bounds = array<i64: 1, 32>}, {pipeline_mode = #tpu.pipeline_mode<synchronous>, transform_indices = @transform_18, window_bounds = array<i64: 2, 32, 32>}, {pipeline_mode = #tpu.pipeline_mode<synchronous>, transform_indices = @transform_19, window_bounds = array<i64: 2, 1, 32>}, {pipeline_mode = #tpu.pipeline_mode<synchronous>, transform_indices = @transform_20, window_bounds = array<i64: 2, 32, 32>}, {pipeline_mode = #tpu.pipeline_mode<synchronous>, transform_indices = @transform_21, window_bounds = array<i64: 2, 1, 32>}, {pipeline_mode = #tpu.pipeline_mode<synchronous>, transform_indices = @transform_22, window_bounds = array<i64: 16, 32>}]} {
    %c0_i32 = arith.constant 0 : i32
    %0 = arith.cmpi eq, %arg0, %c0_i32 : i32
    %1 = arith.extui %0 : i1 to i32
    %c0_i32_0 = arith.constant 0 : i32
    %2 = arith.cmpi ne, %1, %c0_i32_0 : i32
    scf.if %2 {
      %c0_21 = arith.constant 0 : index
      %c0_22 = arith.constant 0 : index
      %31 = vector.load %arg3[%c0_21, %c0_22] : memref<16x32xf32, #tpu.memory_space<vmem>>, vector<16x32xf32>
      %32 = arith.truncf %31 : vector<16x32xf32> to vector<16x32xbf16>
      %c0_23 = arith.constant 0 : index
      %c0_24 = arith.constant 0 : index
      %33 = vector.load %arg4[%c0_23, %c0_24] : memref<16x8xf32, #tpu.memory_space<vmem>>, vector<16x8xf32>
      %c0_25 = arith.constant 0 : index
      %c0_26 = arith.constant 0 : index
      %34 = vector.load %arg6[%c0_25, %c0_26] : memref<8x32xf32, #tpu.memory_space<vmem>>, vector<8x32xf32>
      %cst_27 = arith.constant dense<0.000000e+00> : vector<16x32xf32>
      %35 = tpu.matmul %33, %34, %cst_27 {dimension_numbers = #tpu.dot_dimension_numbers<[1], [0], [0], [1], [0, 0, 1, 1], [], []>} : vector<16x8xf32>, vector<8x32xf32>, vector<16x32xf32> -> vector<16x32xf32>
      %c0_28 = arith.constant 0 : index
      %c0_29 = arith.constant 0 : index
      %36 = vector.load %arg8[%c0_28, %c0_29] : memref<32x32xbf16, #tpu.memory_space<vmem>>, vector<32x32xbf16>
      %cst_30 = arith.constant dense<0.000000e+00> : vector<16x32xf32>
      %37 = tpu.matmul %32, %36, %cst_30 {dimension_numbers = #tpu.dot_dimension_numbers<[1], [0], [0], [1], [0, 0, 1, 1], [], []>} : vector<16x32xbf16>, vector<32x32xbf16>, vector<16x32xf32> -> vector<16x32xf32>
      %c0_31 = arith.constant 0 : index
      %c0_32 = arith.constant 0 : index
      %38 = vector.load %arg9[%c0_31, %c0_32] : memref<1x32xf32, #tpu.memory_space<vmem>>, vector<1x32xf32>
      %39 = vector.broadcast %38 : vector<1x32xf32> to vector<16x32xf32>
      %40 = arith.addf %37, %39 : vector<16x32xf32>
      %41 = arith.negf %40 : vector<16x32xf32>
      %42 = math.exp %41 : vector<16x32xf32>
      %cst_33 = arith.constant 1.000000e+00 : f32
      %43 = vector.broadcast %cst_33 : f32 to vector<16x32xf32>
      %44 = arith.addf %43, %42 : vector<16x32xf32>
      %45 = arith.divf %43, %44 : vector<16x32xf32>
      %46 = arith.mulf %40, %45 : vector<16x32xf32>
      %c0_34 = arith.constant 0 : index
      %c0_35 = arith.constant 0 : index
      %47 = vector.load %arg10[%c0_34, %c0_35] : memref<32x32xbf16, #tpu.memory_space<vmem>>, vector<32x32xbf16>
      %cst_36 = arith.constant dense<0.000000e+00> : vector<16x32xf32>
      %48 = tpu.matmul %32, %47, %cst_36 {dimension_numbers = #tpu.dot_dimension_numbers<[1], [0], [0], [1], [0, 0, 1, 1], [], []>} : vector<16x32xbf16>, vector<32x32xbf16>, vector<16x32xf32> -> vector<16x32xf32>
      %c0_37 = arith.constant 0 : index
      %c0_38 = arith.constant 0 : index
      %49 = vector.load %arg11[%c0_37, %c0_38] : memref<1x32xf32, #tpu.memory_space<vmem>>, vector<1x32xf32>
      %50 = vector.broadcast %49 : vector<1x32xf32> to vector<16x32xf32>
      %51 = arith.addf %48, %50 : vector<16x32xf32>
      %52 = arith.negf %51 : vector<16x32xf32>
      %53 = math.exp %52 : vector<16x32xf32>
      %cst_39 = arith.constant 1.000000e+00 : f32
      %54 = vector.broadcast %cst_39 : f32 to vector<16x32xf32>
      %55 = arith.addf %54, %53 : vector<16x32xf32>
      %56 = arith.divf %54, %55 : vector<16x32xf32>
      %57 = arith.mulf %51, %56 : vector<16x32xf32>
      %58 = arith.mulf %57, %35 : vector<16x32xf32>
      %59 = tpu.concatenate %58, %58, %58, %58, %58, %58, %58, %58 in 1 : vector<16x32xf32>, vector<16x32xf32>, vector<16x32xf32>, vector<16x32xf32>, vector<16x32xf32>, vector<16x32xf32>, vector<16x32xf32>, vector<16x32xf32> -> vector<16x256xf32>
      %c0_40 = arith.constant 0 : index
      %c0_41 = arith.constant 0 : index
      %60 = vector.load %arg24[%c0_40, %c0_41] : memref<16x256xf32, #tpu.memory_space<vmem>>, vector<16x256xf32>
      tpu.vector_store %arg24[%c0_40, %c0_41], %59 {strides = array<i32>} : memref<16x256xf32, #tpu.memory_space<vmem>>, vector<16x256xf32>,
      %c0_42 = arith.constant 0 : index
      %c0_43 = arith.constant 0 : index
      %61 = vector.load %arg25[%c0_42, %c0_43] : memref<16x32xf32, #tpu.memory_space<vmem>>, vector<16x32xf32>
      tpu.vector_store %arg25[%c0_42, %c0_43], %46 {strides = array<i32>} : memref<16x32xf32, #tpu.memory_space<vmem>>, vector<16x32xf32>,
    } else {
    }
    %c0 = arith.constant 0 : index
    %c0_1 = arith.constant 0 : index
    %3 = vector.load %arg5[%c0, %c0_1] : memref<128x32xf32, #tpu.memory_space<vmem>>, vector<128x32xf32>
    %c0_2 = arith.constant 0 : index
    %c0_3 = arith.constant 0 : index
    %4 = vector.load %arg7[%c0_2, %c0_3] : memref<32x256xf32, #tpu.memory_space<vmem>>, vector<32x256xf32>
    %cst = arith.constant dense<0.000000e+00> : vector<128x256xf32>
    %5 = tpu.matmul %3, %4, %cst {dimension_numbers = #tpu.dot_dimension_numbers<[1], [0], [0], [1], [0, 0, 1, 1], [], []>} : vector<128x32xf32>, vector<32x256xf32>, vector<128x256xf32> -> vector<128x256xf32>
    %c0_4 = arith.constant 0 : index
    %c0_5 = arith.constant 0 : index
    %6 = vector.load %arg1[%c0_4, %c0_5] : memref<128x1xi32, #tpu.memory_space<vmem>>, vector<128x1xi32>
    %7 = tpu.iota {dimensions = array<i32: 1>} : vector<128x16xi32>
    %8 = vector.broadcast %6 : vector<128x1xi32> to vector<128x16xi32>
    %9 = arith.cmpi eq, %8, %7 : vector<128x16xi32>
    %10 = arith.extui %9 : vector<128x16xi1> to vector<128x16xi32>
    %11 = arith.sitofp %10 : vector<128x16xi32> to vector<128x16xf32>
    %c0_6 = arith.constant 0 : index
    %c0_7 = arith.constant 0 : index
    %12 = vector.load %arg24[%c0_6, %c0_7] : memref<16x256xf32, #tpu.memory_space<vmem>>, vector<16x256xf32>
    %cst_8 = arith.constant dense<0.000000e+00> : vector<128x256xf32>
    %13 = tpu.matmul %11, %12, %cst_8 {dimension_numbers = #tpu.dot_dimension_numbers<[1], [0], [0], [1], [0, 0, 1, 1], [], []>} : vector<128x16xf32>, vector<16x256xf32>, vector<128x256xf32> -> vector<128x256xf32>
    %14 = arith.mulf %5, %13 : vector<128x256xf32>
    %15 = arith.truncf %14 : vector<128x256xf32> to vector<128x256xbf16>
    %c0_9 = arith.constant 0 : index
    %c0_10 = arith.constant 0 : index
    %16 = vector.load %arg12[%c0_9, %c0_10] : memref<256x32xbf16, #tpu.memory_space<vmem>>, vector<256x32xbf16>
    %cst_11 = arith.constant dense<0.000000e+00> : vector<128x32xf32>
    %17 = tpu.matmul %15, %16, %cst_11 {dimension_numbers = #tpu.dot_dimension_numbers<[1], [0], [0], [1], [0, 0, 1, 1], [], []>} : vector<128x256xbf16>, vector<256x32xbf16>, vector<128x32xf32> -> vector<128x32xf32>
    %c0_12 = arith.constant 0 : index
    %c0_13 = arith.constant 0 : index
    %18 = vector.load %arg2[%c0_12, %c0_13] : memref<1x128xi32, #tpu.memory_space<vmem>>, vector<1x128xi32>
    %19 = tpu.iota {dimensions = array<i32: 0>} : vector<16x128xi32>
    %20 = vector.broadcast %18 : vector<1x128xi32> to vector<16x128xi32>
    %21 = arith.cmpi eq, %19, %20 : vector<16x128xi32>
    %22 = arith.extui %21 : vector<16x128xi1> to vector<16x128xi32>
    %23 = arith.sitofp %22 : vector<16x128xi32> to vector<16x128xf32>
    %c0_14 = arith.constant 0 : index
    %c0_15 = arith.constant 0 : index
    %24 = vector.load %arg25[%c0_14, %c0_15] : memref<16x32xf32, #tpu.memory_space<vmem>>, vector<16x32xf32>
    %cst_16 = arith.constant dense<0.000000e+00> : vector<16x32xf32>
    %25 = tpu.matmul %23, %17, %cst_16 {dimension_numbers = #tpu.dot_dimension_numbers<[1], [0], [0], [1], [0, 0, 1, 1], [], []>} : vector<16x128xf32>, vector<128x32xf32>, vector<16x32xf32> -> vector<16x32xf32>
    %26 = arith.addf %24, %25 : vector<16x32xf32>
    %c0_17 = arith.constant 0 : index
    %c0_18 = arith.constant 0 : index
    %27 = vector.load %arg25[%c0_17, %c0_18] : memref<16x32xf32, #tpu.memory_space<vmem>>, vector<16x32xf32>
    tpu.vector_store %arg25[%c0_17, %c0_18], %26 {strides = array<i32>} : memref<16x32xf32, #tpu.memory_space<vmem>>, vector<16x32xf32>,
    %c0_i32_19 = arith.constant 0 : i32
    %28 = arith.cmpi eq, %arg0, %c0_i32_19 : i32
    %29 = arith.extui %28 : i1 to i32
    %c0_i32_20 = arith.constant 0 : i32
    %30 = arith.cmpi ne, %29, %c0_i32_20 : i32
    scf.if %30 {
      %c0_21 = arith.constant 0 : index
      %c0_22 = arith.constant 0 : index
      %31 = vector.load %arg25[%c0_21, %c0_22] : memref<16x32xf32, #tpu.memory_space<vmem>>, vector<16x32xf32>
      %32 = arith.truncf %31 : vector<16x32xf32> to vector<16x32xbf16>
      %c0_23 = arith.constant 0 : index
      %c0_24 = arith.constant 0 : index
      %c0_25 = arith.constant 0 : index
      %33 = vector.load %arg13[%c0_23, %c0_24, %c0_25] : memref<1x32x32xbf16, #tpu.memory_space<vmem>>, vector<1x32x32xbf16>
      %34 = vector.shape_cast %33 : vector<1x32x32xbf16> to vector<32x32xbf16>
      %cst_26 = arith.constant dense<0.000000e+00> : vector<16x32xf32>
      %35 = tpu.matmul %32, %34, %cst_26 {dimension_numbers = #tpu.dot_dimension_numbers<[1], [0], [0], [1], [0, 0, 1, 1], [], []>} : vector<16x32xbf16>, vector<32x32xbf16>, vector<16x32xf32> -> vector<16x32xf32>
      %c0_27 = arith.constant 0 : index
      %c0_28 = arith.constant 0 : index
      %c0_29 = arith.constant 0 : index
      %36 = vector.load %arg14[%c0_27, %c0_28, %c0_29] : memref<1x1x32xf32, #tpu.memory_space<vmem>>, vector<1x1x32xf32>
      %37 = vector.shape_cast %36 : vector<1x1x32xf32> to vector<1x32xf32>
      %38 = vector.broadcast %37 : vector<1x32xf32> to vector<16x32xf32>
      %39 = arith.addf %35, %38 : vector<16x32xf32>
      %40 = arith.negf %39 : vector<16x32xf32>
      %41 = math.exp %40 : vector<16x32xf32>
      %cst_30 = arith.constant 1.000000e+00 : f32
      %42 = vector.broadcast %cst_30 : f32 to vector<16x32xf32>
      %43 = arith.addf %42, %41 : vector<16x32xf32>
      %44 = arith.divf %42, %43 : vector<16x32xf32>
      %45 = arith.mulf %39, %44 : vector<16x32xf32>
      %46 = arith.truncf %45 : vector<16x32xf32> to vector<16x32xbf16>
      %c0_31 = arith.constant 0 : index
      %c0_32 = arith.constant 0 : index
      %c0_33 = arith.constant 0 : index
      %47 = vector.load %arg15[%c0_31, %c0_32, %c0_33] : memref<1x32x32xbf16, #tpu.memory_space<vmem>>, vector<1x32x32xbf16>
      %48 = vector.shape_cast %47 : vector<1x32x32xbf16> to vector<32x32xbf16>
      %cst_34 = arith.constant dense<0.000000e+00> : vector<16x32xf32>
      %49 = tpu.matmul %46, %48, %cst_34 {dimension_numbers = #tpu.dot_dimension_numbers<[1], [0], [0], [1], [0, 0, 1, 1], [], []>} : vector<16x32xbf16>, vector<32x32xbf16>, vector<16x32xf32> -> vector<16x32xf32>
      %c0_35 = arith.constant 0 : index
      %c0_36 = arith.constant 0 : index
      %c0_37 = arith.constant 0 : index
      %50 = vector.load %arg16[%c0_35, %c0_36, %c0_37] : memref<1x1x32xf32, #tpu.memory_space<vmem>>, vector<1x1x32xf32>
      %51 = vector.shape_cast %50 : vector<1x1x32xf32> to vector<1x32xf32>
      %52 = vector.broadcast %51 : vector<1x32xf32> to vector<16x32xf32>
      %53 = arith.addf %49, %52 : vector<16x32xf32>
      %54 = arith.negf %53 : vector<16x32xf32>
      %55 = math.exp %54 : vector<16x32xf32>
      %cst_38 = arith.constant 1.000000e+00 : f32
      %56 = vector.broadcast %cst_38 : f32 to vector<16x32xf32>
      %57 = arith.addf %56, %55 : vector<16x32xf32>
      %58 = arith.divf %56, %57 : vector<16x32xf32>
      %59 = arith.mulf %53, %58 : vector<16x32xf32>
      %60 = arith.addf %31, %59 : vector<16x32xf32>
      %61 = arith.truncf %60 : vector<16x32xf32> to vector<16x32xbf16>
      %c0_39 = arith.constant 0 : index
      %c0_40 = arith.constant 0 : index
      %62 = vector.load %arg17[%c0_39, %c0_40] : memref<32x32xbf16, #tpu.memory_space<vmem>>, vector<32x32xbf16>
      %cst_41 = arith.constant dense<0.000000e+00> : vector<16x32xf32>
      %63 = tpu.matmul %61, %62, %cst_41 {dimension_numbers = #tpu.dot_dimension_numbers<[1], [0], [0], [1], [0, 0, 1, 1], [], []>} : vector<16x32xbf16>, vector<32x32xbf16>, vector<16x32xf32> -> vector<16x32xf32>
      %c0_42 = arith.constant 0 : index
      %c0_43 = arith.constant 0 : index
      %64 = vector.load %arg18[%c0_42, %c0_43] : memref<1x32xf32, #tpu.memory_space<vmem>>, vector<1x32xf32>
      %65 = vector.broadcast %64 : vector<1x32xf32> to vector<16x32xf32>
      %66 = arith.addf %63, %65 : vector<16x32xf32>
      %67 = arith.negf %66 : vector<16x32xf32>
      %68 = math.exp %67 : vector<16x32xf32>
      %cst_44 = arith.constant 1.000000e+00 : f32
      %69 = vector.broadcast %cst_44 : f32 to vector<16x32xf32>
      %70 = arith.addf %69, %68 : vector<16x32xf32>
      %71 = arith.divf %69, %70 : vector<16x32xf32>
      %72 = arith.mulf %66, %71 : vector<16x32xf32>
      %c0_45 = arith.constant 0 : index
      %c0_46 = arith.constant 0 : index
      %73 = vector.load %arg3[%c0_45, %c0_46] : memref<16x32xf32, #tpu.memory_space<vmem>>, vector<16x32xf32>
      %74 = arith.addf %72, %73 : vector<16x32xf32>
      %75 = arith.truncf %74 : vector<16x32xf32> to vector<16x32xbf16>
      %c0_47 = arith.constant 0 : index
      %c0_48 = arith.constant 0 : index
      %c0_49 = arith.constant 0 : index
      %76 = vector.load %arg19[%c0_47, %c0_48, %c0_49] : memref<2x32x32xbf16, #tpu.memory_space<vmem>>, vector<1x32x32xbf16>
      %77 = vector.shape_cast %76 : vector<1x32x32xbf16> to vector<32x32xbf16>
      %cst_50 = arith.constant dense<0.000000e+00> : vector<16x32xf32>
      %78 = tpu.matmul %75, %77, %cst_50 {dimension_numbers = #tpu.dot_dimension_numbers<[1], [0], [0], [1], [0, 0, 1, 1], [], []>} : vector<16x32xbf16>, vector<32x32xbf16>, vector<16x32xf32> -> vector<16x32xf32>
      %c0_51 = arith.constant 0 : index
      %c0_52 = arith.constant 0 : index
      %c0_53 = arith.constant 0 : index
      %79 = vector.load %arg20[%c0_51, %c0_52, %c0_53] : memref<2x1x32xf32, #tpu.memory_space<vmem>>, vector<1x1x32xf32>
      %80 = vector.shape_cast %79 : vector<1x1x32xf32> to vector<1x32xf32>
      %81 = vector.broadcast %80 : vector<1x32xf32> to vector<16x32xf32>
      %82 = arith.addf %78, %81 : vector<16x32xf32>
      %83 = arith.negf %82 : vector<16x32xf32>
      %84 = math.exp %83 : vector<16x32xf32>
      %cst_54 = arith.constant 1.000000e+00 : f32
      %85 = vector.broadcast %cst_54 : f32 to vector<16x32xf32>
      %86 = arith.addf %85, %84 : vector<16x32xf32>
      %87 = arith.divf %85, %86 : vector<16x32xf32>
      %88 = arith.mulf %82, %87 : vector<16x32xf32>
      %89 = arith.truncf %88 : vector<16x32xf32> to vector<16x32xbf16>
      %c0_55 = arith.constant 0 : index
      %c0_56 = arith.constant 0 : index
      %c0_57 = arith.constant 0 : index
      %90 = vector.load %arg21[%c0_55, %c0_56, %c0_57] : memref<2x32x32xbf16, #tpu.memory_space<vmem>>, vector<1x32x32xbf16>
      %91 = vector.shape_cast %90 : vector<1x32x32xbf16> to vector<32x32xbf16>
      %cst_58 = arith.constant dense<0.000000e+00> : vector<16x32xf32>
      %92 = tpu.matmul %89, %91, %cst_58 {dimension_numbers = #tpu.dot_dimension_numbers<[1], [0], [0], [1], [0, 0, 1, 1], [], []>} : vector<16x32xbf16>, vector<32x32xbf16>, vector<16x32xf32> -> vector<16x32xf32>
      %c0_59 = arith.constant 0 : index
      %c0_60 = arith.constant 0 : index
      %c0_61 = arith.constant 0 : index
      %93 = vector.load %arg22[%c0_59, %c0_60, %c0_61] : memref<2x1x32xf32, #tpu.memory_space<vmem>>, vector<1x1x32xf32>
      %94 = vector.shape_cast %93 : vector<1x1x32xf32> to vector<1x32xf32>
      %95 = vector.broadcast %94 : vector<1x32xf32> to vector<16x32xf32>
      %96 = arith.addf %92, %95 : vector<16x32xf32>
      %97 = arith.negf %96 : vector<16x32xf32>
      %98 = math.exp %97 : vector<16x32xf32>
      %cst_62 = arith.constant 1.000000e+00 : f32
      %99 = vector.broadcast %cst_62 : f32 to vector<16x32xf32>
      %100 = arith.addf %99, %98 : vector<16x32xf32>
      %101 = arith.divf %99, %100 : vector<16x32xf32>
      %102 = arith.mulf %96, %101 : vector<16x32xf32>
      %103 = arith.addf %74, %102 : vector<16x32xf32>
      %104 = arith.truncf %103 : vector<16x32xf32> to vector<16x32xbf16>
      %c1 = arith.constant 1 : index
      %c0_63 = arith.constant 0 : index
      %c0_64 = arith.constant 0 : index
      %105 = vector.load %arg19[%c1, %c0_63, %c0_64] : memref<2x32x32xbf16, #tpu.memory_space<vmem>>, vector<1x32x32xbf16>
      %106 = vector.shape_cast %105 : vector<1x32x32xbf16> to vector<32x32xbf16>
      %cst_65 = arith.constant dense<0.000000e+00> : vector<16x32xf32>
      %107 = tpu.matmul %104, %106, %cst_65 {dimension_numbers = #tpu.dot_dimension_numbers<[1], [0], [0], [1], [0, 0, 1, 1], [], []>} : vector<16x32xbf16>, vector<32x32xbf16>, vector<16x32xf32> -> vector<16x32xf32>
      %c1_66 = arith.constant 1 : index
      %c0_67 = arith.constant 0 : index
      %c0_68 = arith.constant 0 : index
      %108 = vector.load %arg20[%c1_66, %c0_67, %c0_68] : memref<2x1x32xf32, #tpu.memory_space<vmem>>, vector<1x1x32xf32>
      %109 = vector.shape_cast %108 : vector<1x1x32xf32> to vector<1x32xf32>
      %110 = vector.broadcast %109 : vector<1x32xf32> to vector<16x32xf32>
      %111 = arith.addf %107, %110 : vector<16x32xf32>
      %112 = arith.negf %111 : vector<16x32xf32>
      %113 = math.exp %112 : vector<16x32xf32>
      %cst_69 = arith.constant 1.000000e+00 : f32
      %114 = vector.broadcast %cst_69 : f32 to vector<16x32xf32>
      %115 = arith.addf %114, %113 : vector<16x32xf32>
      %116 = arith.divf %114, %115 : vector<16x32xf32>
      %117 = arith.mulf %111, %116 : vector<16x32xf32>
      %118 = arith.truncf %117 : vector<16x32xf32> to vector<16x32xbf16>
      %c1_70 = arith.constant 1 : index
      %c0_71 = arith.constant 0 : index
      %c0_72 = arith.constant 0 : index
      %119 = vector.load %arg21[%c1_70, %c0_71, %c0_72] : memref<2x32x32xbf16, #tpu.memory_space<vmem>>, vector<1x32x32xbf16>
      %120 = vector.shape_cast %119 : vector<1x32x32xbf16> to vector<32x32xbf16>
      %cst_73 = arith.constant dense<0.000000e+00> : vector<16x32xf32>
      %121 = tpu.matmul %118, %120, %cst_73 {dimension_numbers = #tpu.dot_dimension_numbers<[1], [0], [0], [1], [0, 0, 1, 1], [], []>} : vector<16x32xbf16>, vector<32x32xbf16>, vector<16x32xf32> -> vector<16x32xf32>
      %c1_74 = arith.constant 1 : index
      %c0_75 = arith.constant 0 : index
      %c0_76 = arith.constant 0 : index
      %122 = vector.load %arg22[%c1_74, %c0_75, %c0_76] : memref<2x1x32xf32, #tpu.memory_space<vmem>>, vector<1x1x32xf32>
      %123 = vector.shape_cast %122 : vector<1x1x32xf32> to vector<1x32xf32>
      %124 = vector.broadcast %123 : vector<1x32xf32> to vector<16x32xf32>
      %125 = arith.addf %121, %124 : vector<16x32xf32>
      %126 = arith.negf %125 : vector<16x32xf32>
      %127 = math.exp %126 : vector<16x32xf32>
      %cst_77 = arith.constant 1.000000e+00 : f32
      %128 = vector.broadcast %cst_77 : f32 to vector<16x32xf32>
      %129 = arith.addf %128, %127 : vector<16x32xf32>
      %130 = arith.divf %128, %129 : vector<16x32xf32>
      %131 = arith.mulf %125, %130 : vector<16x32xf32>
      %132 = arith.addf %103, %131 : vector<16x32xf32>
      %c0_78 = arith.constant 0 : index
      %c0_79 = arith.constant 0 : index
      %133 = vector.load %arg23[%c0_78, %c0_79] : memref<16x32xf32, #tpu.memory_space<vmem>>, vector<16x32xf32>
      tpu.vector_store %arg23[%c0_78, %c0_79], %132 {strides = array<i32>} : memref<16x32xf32, #tpu.memory_space<vmem>>, vector<16x32xf32>,
    } else {
    }
    return
  }
  func.func @transform_0(%arg0: i32) -> (i32, i32) {
    %c0_i32 = arith.constant 0 : i32
    %c0_i32_0 = arith.constant 0 : i32
    return %arg0, %c0_i32 : i32, i32
  }
  func.func @transform_1(%arg0: i32) -> (i32, i32) {
    %c0_i32 = arith.constant 0 : i32
    %c0_i32_0 = arith.constant 0 : i32
    return %c0_i32, %arg0 : i32, i32
  }
  func.func @transform_2(%arg0: i32) -> (i32, i32) {
    %c0_i32 = arith.constant 0 : i32
    %c0_i32_0 = arith.constant 0 : i32
    %c0_i32_1 = arith.constant 0 : i32
    return %c0_i32, %c0_i32_0 : i32, i32
  }
  func.func @transform_3(%arg0: i32) -> (i32, i32) {
    %c0_i32 = arith.constant 0 : i32
    %c0_i32_0 = arith.constant 0 : i32
    %c0_i32_1 = arith.constant 0 : i32
    return %c0_i32, %c0_i32_0 : i32, i32
  }
  func.func @transform_4(%arg0: i32) -> (i32, i32) {
    %c0_i32 = arith.constant 0 : i32
    %c0_i32_0 = arith.constant 0 : i32
    return %arg0, %c0_i32 : i32, i32
  }
  func.func @transform_5(%arg0: i32) -> (i32, i32) {
    %c0_i32 = arith.constant 0 : i32
    %c0_i32_0 = arith.constant 0 : i32
    %c0_i32_1 = arith.constant 0 : i32
    return %c0_i32, %c0_i32_0 : i32, i32
  }
  func.func @transform_6(%arg0: i32) -> (i32, i32) {
    %c0_i32 = arith.constant 0 : i32
    %c0_i32_0 = arith.constant 0 : i32
    %c0_i32_1 = arith.constant 0 : i32
    return %c0_i32, %c0_i32_0 : i32, i32
  }
  func.func @transform_7(%arg0: i32) -> (i32, i32) {
    %c0_i32 = arith.constant 0 : i32
    %c0_i32_0 = arith.constant 0 : i32
    %c0_i32_1 = arith.constant 0 : i32
    return %c0_i32, %c0_i32_0 : i32, i32
  }
  func.func @transform_8(%arg0: i32) -> (i32, i32) {
    %c0_i32 = arith.constant 0 : i32
    %c0_i32_0 = arith.constant 0 : i32
    %c0_i32_1 = arith.constant 0 : i32
    return %c0_i32, %c0_i32_0 : i32, i32
  }
  func.func @transform_9(%arg0: i32) -> (i32, i32) {
    %c0_i32 = arith.constant 0 : i32
    %c0_i32_0 = arith.constant 0 : i32
    %c0_i32_1 = arith.constant 0 : i32
    return %c0_i32, %c0_i32_0 : i32, i32
  }
  func.func @transform_10(%arg0: i32) -> (i32, i32) {
    %c0_i32 = arith.constant 0 : i32
    %c0_i32_0 = arith.constant 0 : i32
    %c0_i32_1 = arith.constant 0 : i32
    return %c0_i32, %c0_i32_0 : i32, i32
  }
  func.func @transform_11(%arg0: i32) -> (i32, i32) {
    %c0_i32 = arith.constant 0 : i32
    %c0_i32_0 = arith.constant 0 : i32
    %c0_i32_1 = arith.constant 0 : i32
    return %c0_i32, %c0_i32_0 : i32, i32
  }
  func.func @transform_12(%arg0: i32) -> (i32, i32, i32) {
    %c0_i32 = arith.constant 0 : i32
    %c0_i32_0 = arith.constant 0 : i32
    %c0_i32_1 = arith.constant 0 : i32
    %c0_i32_2 = arith.constant 0 : i32
    return %c0_i32, %c0_i32_0, %c0_i32_1 : i32, i32, i32
  }
  func.func @transform_13(%arg0: i32) -> (i32, i32, i32) {
    %c0_i32 = arith.constant 0 : i32
    %c0_i32_0 = arith.constant 0 : i32
    %c0_i32_1 = arith.constant 0 : i32
    %c0_i32_2 = arith.constant 0 : i32
    return %c0_i32, %c0_i32_0, %c0_i32_1 : i32, i32, i32
  }
  func.func @transform_14(%arg0: i32) -> (i32, i32, i32) {
    %c0_i32 = arith.constant 0 : i32
    %c0_i32_0 = arith.constant 0 : i32
    %c0_i32_1 = arith.constant 0 : i32
    %c0_i32_2 = arith.constant 0 : i32
    return %c0_i32, %c0_i32_0, %c0_i32_1 : i32, i32, i32
  }
  func.func @transform_15(%arg0: i32) -> (i32, i32, i32) {
    %c0_i32 = arith.constant 0 : i32
    %c0_i32_0 = arith.constant 0 : i32
    %c0_i32_1 = arith.constant 0 : i32
    %c0_i32_2 = arith.constant 0 : i32
    return %c0_i32, %c0_i32_0, %c0_i32_1 : i32, i32, i32
  }
  func.func @transform_16(%arg0: i32) -> (i32, i32) {
    %c0_i32 = arith.constant 0 : i32
    %c0_i32_0 = arith.constant 0 : i32
    %c0_i32_1 = arith.constant 0 : i32
    return %c0_i32, %c0_i32_0 : i32, i32
  }
  func.func @transform_17(%arg0: i32) -> (i32, i32) {
    %c0_i32 = arith.constant 0 : i32
    %c0_i32_0 = arith.constant 0 : i32
    %c0_i32_1 = arith.constant 0 : i32
    return %c0_i32, %c0_i32_0 : i32, i32
  }
  func.func @transform_18(%arg0: i32) -> (i32, i32, i32) {
    %c0_i32 = arith.constant 0 : i32
    %c0_i32_0 = arith.constant 0 : i32
    %c0_i32_1 = arith.constant 0 : i32
    %c0_i32_2 = arith.constant 0 : i32
    return %c0_i32, %c0_i32_0, %c0_i32_1 : i32, i32, i32
  }
  func.func @transform_19(%arg0: i32) -> (i32, i32, i32) {
    %c0_i32 = arith.constant 0 : i32
    %c0_i32_0 = arith.constant 0 : i32
    %c0_i32_1 = arith.constant 0 : i32
    %c0_i32_2 = arith.constant 0 : i32
    return %c0_i32, %c0_i32_0, %c0_i32_1 : i32, i32, i32
  }
  func.func @transform_20(%arg0: i32) -> (i32, i32, i32) {
    %c0_i32 = arith.constant 0 : i32
    %c0_i32_0 = arith.constant 0 : i32
    %c0_i32_1 = arith.constant 0 : i32
    %c0_i32_2 = arith.constant 0 : i32
    return %c0_i32, %c0_i32_0, %c0_i32_1 : i32, i32, i32
  }
  func.func @transform_21(%arg0: i32) -> (i32, i32, i32) {
    %c0_i32 = arith.constant 0 : i32
    %c0_i32_0 = arith.constant 0 : i32
    %c0_i32_1 = arith.constant 0 : i32
    %c0_i32_2 = arith.constant 0 : i32
    return %c0_i32, %c0_i32_0, %c0_i32_1 : i32, i32, i32
  }
  func.func @transform_22(%arg0: i32) -> (i32, i32) {
    %c0_i32 = arith.constant 0 : i32
    %c0_i32_0 = arith.constant 0 : i32
    %c0_i32_1 = arith.constant 0 : i32
    return %c0_i32, %c0_i32_0 : i32, i32
  }
}

</mosaic_0001>

<bundles_post_ra>
// kernel: tpu_custom_call.1
= control target key start
LH: loop header
LB: loop body
LE: loop exit
PB: predicated region body
PF: predicated region fallthrough
CT: control target
= control target key end

     0   :  { %s3097_s0 = inlined_call_operand.vmem [shape: s32[128,1], index: 0, kind: input, shape index: {}]   ;;  %s3098_s1 = inlined_call_operand.vmem [shape: s32[1,128], index: 1, kind: input, shape index: {}]   ;;  %s3099_s2 = inlined_call_operand.vmem [shape: f32[16,32], index: 2, kind: input, shape index: {}]   ;;  %s3100_s3 = inlined_call_operand.vmem [shape: f32[16,8], index: 3, kind: input, shape index: {}]   ;;  %s3101_s4 = inlined_call_operand.vmem [shape: f32[128,32], index: 4, kind: input, shape index: {}]   ;;  %s3102_s5 = inlined_call_operand.vmem [shape: f32[8,32], index: 5, kind: input, shape index: {}]   ;;  %s3103_s6 = inlined_call_operand.vmem [shape: f32[32,256], index: 6, kind: input, shape index: {}]   ;;  %s3104_s7 = inlined_call_operand.vmem [shape: bf16[32,32], index: 7, kind: input, shape index: {}]   ;;  %s3105_s8 = inlined_call_operand.vmem [shape: f32[1,32], index: 8, kind: input, shape index: {}]   ;;  %s3106_s9 = inlined_call_operand.vmem [shape: bf16[32,32], index: 9, kind: input, shape index: {}]   ;;  %s3107_s10 = inlined_call_operand.vmem [shape: f32[1,32], index: 10, kind: input, shape index: {}]   ;;  %s3108_s11 = inlined_call_operand.vmem [shape: bf16[256,32], index: 11, kind: input, shape index: {}]   ;;  %s3109_s12 = inlined_call_operand.vmem [shape: bf16[1,32,32], index: 12, kind: input, shape index: {}]   ;;  %s3110_s13 = inlined_call_operand.vmem [shape: f32[1,1,32], index: 13, kind: input, shape index: {}]   ;;  %s3111_s14 = inlined_call_operand.vmem [shape: bf16[1,32,32], index: 14, kind: input, shape index: {}]   ;;  %s3112_s15 = inlined_call_operand.vmem [shape: f32[1,1,32], index: 15, kind: input, shape index: {}]   ;;  %s3113_s16 = inlined_call_operand.vmem [shape: bf16[32,32], index: 16, kind: input, shape index: {}]   ;;  %s3114_s17 = inlined_call_operand.vmem [shape: f32[1,32], index: 17, kind: input, shape index: {}]   ;;  %s3115_s18 = inlined_call_operand.vmem [shape: bf16[2,32,32], index: 18, kind: input, shape index: {}]   ;;  %s3116_s19 = inlined_call_operand.vmem [shape: f32[2,1,32], index: 19, kind: input, shape index: {}]   ;;  %s3117_s20 = inlined_call_operand.vmem [shape: bf16[2,32,32], index: 20, kind: input, shape index: {}]   ;;  %s3118_s21 = inlined_call_operand.vmem [shape: f32[2,1,32], index: 21, kind: input, shape index: {}]   ;;  %s3119_s22 = inlined_call_operand.hbm [shape: f32[16,32], index: 22, kind: output, shape index: {}]  }
   0x1   :  { %3125 = sst [smem:[#allocation7_spill]] %s3097_s0 }
   0x2   :  { %3126 = sst [smem:[#allocation8_spill]] %s3098_s1 }
   0x3   :  { %3127 = sst [smem:[#allocation9_spill]] %s3099_s2 }
   0x4   :  { %3128 = sst [smem:[#allocation10_spill]] %s3100_s3 }
   0x5   :  { %3129 = sst [smem:[#allocation11_spill]] %s3101_s4 }
   0x6   :  { %3130 = sst [smem:[#allocation12_spill]] %s3102_s5 }
   0x7   :  { %3131 = sst [smem:[#allocation13_spill]] %s3103_s6 }
   0x8   :  { %3132 = sst [smem:[#allocation14_spill]] %s3114_s17 }
   0x9   :  { %s3133_s29 = sld [smem:[#allocation12_spill]]  ;;  %s3134_s17 = sld [smem:[#allocation10_spill]]  ;;  %vm83_vm0 = vcmask 64512   ;;  %v2332_v3 = vld [vmem:[%s3106_s9] sm:$0xff]   ;;  %v2333_v4 = vld [vmem:[%s3106_s9 + $0x8] sm:$0xff]   ;;  %v2462_v5 = vmov 0.0  }
   0xa   :  { %2154 = vmatprep.subr.bf16.mxu1 %v2462_v5  ;;  %vm188_vm1 = vcmask 261120   ;;  %vm2463_vm2 = vmmov 0  }
   0xb   :  { %2158 = vmatprep.mubr.msk.bf16.mxu1 %vm2463_vm2, %v2462_v5 }
   0xf   :  { %v82_v0 = vld [vmem:[%s3133_s29] sm:$0xff]  ;;  %v81_v2 = vld [vmem:[%s3134_s17 + $0x8] sm:$0xff] }
  0x10   :  { %v80_v1 = vld [vmem:[%s3134_s17] sm:$0xff]  ;;  %2149 = vmatprep.subr.mxu0 %v82_v0  ;;  %s3135_s17 = sld [smem:[#allocation9_spill]] }
  0x11   :  { %2151 = vmatprep.mubr.msk.f32.mxu0 %vm83_vm0, %v80_v1  ;;  %2150 = vmatpush3.msra.mxu0 %v82_v0 }
  0x12   :  { %2152 = vmatmul.mubr.msk.f32.vlgmr.msra.gmra.mrb[0].mxu0 %vm83_vm0, %v81_v2  ;;  %2162 = vmatprep.subr.bf16.mxu0 %v2462_v5 }
  0x13   :  { %2163 = vmatpush3.bf16.msra.mxu0 %v2332_v3  ;;  %2166 = vmatprep.mubr.msk.bf16.mxu0 %vm2463_vm2, %v2462_v5 }
  0x14   :  { %2164 = vmatprep.subr.bf16.mxu0 %v2462_v5 }
  0x16   :  { %v77_v6 = vld [vmem:[%s3135_s17] sm:$0xff]  ;;  %v78_v7 = vld [vmem:[%s3135_s17 + $0x8] sm:$0xff] }
  0x17   :  { %v79_v8 = vpack.c.bf16 %v78_v7, %v77_v6  ;;  %2165 = vmatpush3.bf16.msra.mxu0 %v2333_v4 }
  0x1a   :  { %2167 = vmatmul.mubr.msk.bf16.vlgmr.msra.gmra.mrb[4].mxu0 %vm188_vm1, %v79_v8 }
  0x1b   :  { %826 = vmatprep.mubr.f32.mxu0 %v2462_v5 }
  0x1c   :  { %27 = vsyncpa [#allocation5], 0  ;;  %v2464_v9 = vmov 0   ;;  %v2334_v10 = vld [vmem:[%s3104_s7] sm:$0xff]   ;;  %v2335_v11 = vld [vmem:[%s3104_s7 + $0x8] sm:$0xff]   ;;  %s3136_s0 = sld [smem:[#allocation13_spill]] }
  0x1d   :  { %2320 = vset.pattern.permute.xlu0 %v2464_v9  ;;  %2331 = vset.pattern.permute.xlu1 %v2464_v9  ;;  %v1910_v14 = vld [vmem:[%s3107_s10] ss:$0 sm:$0xff]  ;;  %s2465_s4 = smov 64   ;;  %s2466_s7 = smov 32   ;;  %vm349_vm3 = vcmask 523264   ;;  %vm352_vm4 = vcmask 785408  }
  0x1e   :  { %2155 = vmatpush3.bf16.msra.mxu1 %v2334_v10  ;;  %s3137_s1 = sld [smem:[#allocation7_spill]]  ;;  %s2467_s5 = smov 96   ;;  %vm713_vm5 = vcmask 130048  }
  0x1f   :  { %2156 = vmatprep.subr.bf16.mxu1 %v2462_v5  ;;  %s3138_s25 = sld [smem:[#allocation11_spill]]  ;;  %s2469_s9 = smov [#allocation4]  }
  0x22   :  { %2157 = vmatpush3.bf16.msra.mxu1 %v2335_v11  ;;  %v378_v32 = vld [vmem:[%s3136_s0 + $0x8] sm:$0xff]  ;;  %v380_v33 = vld [vmem:[%s3136_s0 + $0x18] sm:$0xff]  ;;  %v377_v35 = vld [vmem:[%s3136_s0] sm:$0xff] }
  0x23   :  { %v2261_v34 = vpack.c.bf16 %v380_v33, %v378_v32  ;;  %v379_v36 = vld [vmem:[%s3136_s0 + $0x10] sm:$0xff]  ;;  %v382_v39 = vld [vmem:[%s3136_s0 + $0x28] sm:$0xff]  ;;  %v384_v40 = vld [vmem:[%s3136_s0 + $0x38] sm:$0xff] }
  0x24   :  { %v2263_v38 = vpack.c.bf16 %v379_v36, %v377_v35  ;;  %v381_v41 = vld [vmem:[%s3136_s0 + $0x20] sm:$0xff]  ;;  %v2265_v43 = vpack.c.bf16 %v384_v40, %v382_v39  ;;  %v383_v44 = vld [vmem:[%s3136_s0 + $0x30] sm:$0xff]  ;;  %v596_v48 = vld [vmem:[%s3137_s1 + $0x8] sm:$0xff] }
  0x25   :  { %2159 = vmatmul.mubr.msk.bf16.vlgmr.msra.gmra.mrb[0].mxu1 %vm188_vm1, %v79_v8  ;;  %2262 = vmatprep.subr.bf16.mxu1 %v2261_v34  ;;  %v2267_v45 = vpack.c.bf16 %v383_v44, %v381_v41  ;;  %v595_v46 = vld [vmem:[%s3137_s1] sm:$0xff]  ;;  %v597_v49 = vld [vmem:[%s3137_s1 + $0x10] sm:$0xff]  ;;  %v362_v50 = vld [vmem:[%s3138_s25 + $0x8] sm:$0xff] }
  0x26   :  { %498 = vmatprep.mubr.f32.mxu1 %v2462_v5  ;;  %2264 = vmatpush1.bf16.msra.mxu1 %v2263_v38  ;;  %v361_v47 = vld [vmem:[%s3138_s25] sm:$0xff]  ;;  %v598_v51 = vld [vmem:[%s3137_s1 + $0x18] sm:$0xff]  ;;  %v363_v53 = vld [vmem:[%s3138_s25 + $0x10] sm:$0xff] }
  0x27   :  { %2266 = vmatprep.subr.bf16.mxu1 %v2265_v43  ;;  %v599_v52 = vld [vmem:[%s3137_s1 + $0x20] sm:$0xff]  ;;  %v600_v54 = vld [vmem:[%s3137_s1 + $0x28] sm:$0xff]  ;;  %v601_v55 = vld [vmem:[%s3137_s1 + $0x30] sm:$0xff] }
  0x28   :  { %v364_v56 = vld [vmem:[%s3138_s25 + $0x18] sm:$0xff]  ;;  %v603_v58 = vld [vmem:[%s3137_s1 + $0x40] sm:$0xff]  ;;  %v604_v60 = vld [vmem:[%s3137_s1 + $0x48] sm:$0xff] }
  0x29   :  { %v602_v57 = vld [vmem:[%s3137_s1 + $0x38] sm:$0xff]  ;;  %v365_v59 = vld [vmem:[%s3138_s25 + $0x20] sm:$0xff]  ;;  %v605_v61 = vld [vmem:[%s3137_s1 + $0x50] sm:$0xff] }
  0x2a   :  { %2268 = vmatpush1.bf16.msra.mxu1 %v2267_v45  ;;  %v366_v62 = vld [vmem:[%s3138_s25 + $0x28] sm:$0xff]  ;;  %v606_v63 = vld [vmem:[%s3137_s1 + $0x58] sm:$0xff]  ;;  %v607_v0 = vld [vmem:[%s3137_s1 + $0x60] sm:$0xff] }
  0x2b   :  { %v367_v1 = vld [vmem:[%s3138_s25 + $0x30] sm:$0xff]  ;;  %v608_v2 = vld [vmem:[%s3137_s1 + $0x68] sm:$0xff]  ;;  %v368_v4 = vld [vmem:[%s3138_s25 + $0x38] sm:$0xff] }
  0x2c   :  { %v609_v3 = vld [vmem:[%s3137_s1 + $0x70] sm:$0xff]  ;;  %v610_v6 = vld [vmem:[%s3137_s1 + $0x78] sm:$0xff]  ;;  %v369_v7 = vld [vmem:[%s3138_s25 + $0x40] sm:$0xff] }
  0x2d   :  { %1916 = vmatmul.mubr.msk.f32.vlgmr.msra.gmra.mrb[4].mxu1 %vm188_vm1, %v361_v47  ;;  %v370_v8 = vld [vmem:[%s3138_s25 + $0x48] sm:$0xff]  ;;  %v371_v9 = vld [vmem:[%s3138_s25 + $0x50] sm:$0xff]  ;;  %v372_v10 = vld [vmem:[%s3138_s25 + $0x58] sm:$0xff] }
  0x2e   :  { %504 = vmatprep.mubr.f32.mxu1 %v2462_v5  ;;  %v373_v11 = vld [vmem:[%s3138_s25 + $0x60] sm:$0xff] }
  0x31   :  { %1917 = vmatmul.mubr.msk.f32.gmra.mrb[6].mxu1 %vm188_vm1, %v362_v50 }
  0x32   :  { %510 = vmatprep.mubr.f32.mxu1 %v2462_v5 }
  0x35   :  { %1918 = vmatmul.mubr.msk.f32.gmra.mrb[8].mxu1 %vm188_vm1, %v363_v53 }
  0x36   :  { %516 = vmatprep.mubr.f32.mxu1 %v2462_v5 }
  0x39   :  { %1919 = vmatmul.mubr.msk.f32.gmra.mrb[10].mxu1 %vm188_vm1, %v364_v56 }
  0x3a   :  { %522 = vmatprep.mubr.f32.mxu1 %v2462_v5 }
  0x3d   :  { %1920 = vmatmul.mubr.msk.f32.gmra.mrb[12].mxu1 %vm188_vm1, %v365_v59 }
  0x3e   :  { %528 = vmatprep.mubr.f32.mxu1 %v2462_v5 }
  0x41   :  { %1921 = vmatmul.mubr.msk.f32.gmra.mrb[14].mxu1 %vm188_vm1, %v366_v62 }
  0x42   :  { %534 = vmatprep.mubr.f32.mxu1 %v2462_v5 }
  0x45   :  { %1922 = vmatmul.mubr.msk.f32.gmra.mrb[16].mxu1 %vm188_vm1, %v367_v1 }
  0x46   :  { %540 = vmatprep.mubr.f32.mxu1 %v2462_v5 }
  0x49   :  { %1923 = vmatmul.mubr.msk.f32.gmra.mrb[18].mxu1 %vm188_vm1, %v368_v4 }
  0x4a   :  { %546 = vmatprep.mubr.f32.mxu1 %v2462_v5 }
  0x4d   :  { %1924 = vmatmul.mubr.msk.f32.gmra.mrb[20].mxu1 %vm188_vm1, %v369_v7 }
  0x4e   :  { %552 = vmatprep.mubr.f32.mxu1 %v2462_v5 }
  0x51   :  { %1925 = vmatmul.mubr.msk.f32.gmra.mrb[22].mxu1 %vm188_vm1, %v370_v8 }
  0x52   :  { %558 = vmatprep.mubr.f32.mxu1 %v2462_v5 }
  0x55   :  { %1926 = vmatmul.mubr.msk.f32.gmra.mrb[24].mxu1 %vm188_vm1, %v371_v9 }
  0x56   :  { %564 = vmatprep.mubr.f32.mxu1 %v2462_v5 }
  0x59   :  { %1927 = vmatmul.mubr.msk.f32.gmra.mrb[26].mxu1 %vm188_vm1, %v372_v10 }
  0x5a   :  { %570 = vmatprep.mubr.f32.mxu1 %v2462_v5 }
  0x5d   :  { %1928 = vmatmul.mubr.msk.f32.gmra.mrb[28].mxu1 %vm188_vm1, %v373_v11 }
  0x5e   :  { %576 = vmatprep.mubr.f32.mxu1 %v2462_v5 }
  0xe5   :  { %v2153_v12 = vpop.f32.mrb[0].mxu0 }
  0xe6   :  { %v156_v13 = vpop.f32.mrb[1].mxu0 }
  0xed   :  { %v304_v15 = vpop.f32.mrb[4].mxu0 }
  0xee   :  { %v305_v16 = vadd.f32 %v1910_v14, %v304_v15  ;;  %v2168_v17 = vpop.f32.mrb[5].mxu0  ;;  %v2336_v15 = vld [vmem:[%s3108_s11 + $0x40] sm:$0xff]  }
  0xef   :  { %v307_v18 = vpop.f32.mrb[6].mxu0  ;;  %v2338_v17 = vld [vmem:[%s3108_s11 + $0x48] sm:$0xff]   ;;  %2046 = vmatprep.subr.bf16.mxu1 %v2336_v15 }
  0xf0   :  { %v1914_v19 = vmul.f32 -1.442695, %v305_v16  ;;  %v308_v20 = vadd.f32 %v1910_v14, %v307_v18  ;;  %v2169_v21 = vpop.f32.mrb[7].mxu0  ;;  %v376_v14 = vld [vmem:[%s3138_s25 + $0x78] sm:$0xff]  ;;  %v2339_v18 = vld [vmem:[%s3108_s11 + $0x8] sm:$0xff]  }
  0xf1   :  { %v2342_v21 = vld [vmem:[%s3108_s11 + $0x58] sm:$0xff]  }
  0xf2   :  { %2366 = vpow2.f32 %v1914_v19  ;;  %v1915_v22 = vmul.f32 -1.442695, %v308_v20  ;;  %v2340_v19 = vld [vmem:[%s3108_s11 + $0x50] sm:$0xff]  }
  0xf4   :  { %2368 = vpow2.f32 %v1915_v22  ;;  %v2343_v22 = vld [vmem:[%s3108_s11 + $0x18] sm:$0xff]  }
  0xfc   :  { %v2367_v23 = vpop.eup %2366 }
  0xfd   :  { %v317_v24 = vadd.f32 1.0, %v2367_v23  ;;  %v2344_v23 = vld [vmem:[%s3108_s11 + $0x60] sm:$0xff]  }
  0xfe   :  { %v2369_v25 = vpop.eup %2368 }
  0xff   :  { %2370 = vrcp.f32 %v317_v24  ;;  %v318_v26 = vadd.f32 1.0, %v2369_v25  ;;  %v2345_v24 = vld [vmem:[%s3108_s11 + $0x20] sm:$0xff]   ;;  %v2346_v25 = vld [vmem:[%s3108_s11 + $0x68] sm:$0xff]  }
 0x101   :  { %2372 = vrcp.f32 %v318_v26  ;;  %v2347_v26 = vld [vmem:[%s3108_s11 + $0x28] sm:$0xff]  }
 0x109   :  { %v2371_v27 = vpop.eup %2370 }
 0x10a   :  { %v323_v28 = vmul.f32 %v2371_v27, %v305_v16  ;;  %v2337_v16 = vld [vmem:[%s3108_s11] sm:$0xff]   ;;  %v2348_v27 = vld [vmem:[%s3108_s11 + $0x70] sm:$0xff]  }
 0x10b   :  { %v2373_v29 = vpop.eup %2372  ;;  %2047 = vmatpush3.bf16.msra.mxu1 %v2337_v16 }
 0x10c   :  { %v2629_v30 = vmul.f32 %v323_v28, %v156_v13  ;;  %v324_v31 = vmul.f32 %v2373_v29, %v308_v20  ;;  %v375_v13 = vld [vmem:[%s3138_s25 + $0x70] sm:$0xff]  ;;  %2048 = vmatprep.subr.bf16.mxu1 %v2338_v17 }
 0x10d   :  { %v2341_v20 = vld [vmem:[%s3108_s11 + $0x10] sm:$0xff]  }
 0x10e   :  { %v2643_v37 = vmul.f32 %v2153_v12, %v324_v31  ;;  %v374_v12 = vld [vmem:[%s3138_s25 + $0x68] sm:$0xff] }
 0x10f   :  { %1929 = vmatmul.mubr.msk.f32.gmra.mrb[30].mxu1 %vm188_vm1, %v374_v12 }
 0x110   :  { %v2321_v42 = vpack.i.bf16 %v2643_v37, %v2629_v30  ;;  %582 = vmatprep.mubr.f32.mxu1 %v2462_v5  ;;  %2049 = vmatpush3.bf16.msra.mxu1 %v2339_v18 }
 0x111   :  { %2050 = vmatprep.subr.bf16.mxu1 %v2340_v19 }
 0x112   :  { %2322 = vrot.lane.b32.xlu1 %v2321_v42, %s2465_s4  ;;  %2316 = vrot.lane.b32.xlu0 %v2321_v42, %s2466_s7  ;;  %s3139_s4 = sld [smem:[#allocation8_spill]] }
 0x113   :  { %1930 = vmatmul.mubr.msk.f32.gmra.mrb[32].mxu1 %vm188_vm1, %v375_v13 }
 0x114   :  { %588 = vmatprep.mubr.f32.mxu1 %v2462_v5  ;;  %2051 = vmatpush3.bf16.msra.mxu1 %v2341_v20 }
 0x115   :  { %2052 = vmatprep.subr.bf16.mxu1 %v2342_v21 }
 0x116   :  { %2327 = vrot.lane.b32.xlu1 %v2321_v42, %s2467_s5  ;;  %614 = vperm.xlu0 %2320, %v595_v46   ;;  %v611_v46 = vlaneseq }
 0x117   :  { %1931 = vmatmul.mubr.msk.f32.gmra.mrb[34].mxu1 %vm188_vm1, %v376_v14 }
 0x118   :  { %2053 = vmatpush3.bf16.msra.mxu1 %v2343_v22  ;;  %v2833_v47 = vand.u32 127, %v611_v46 }
 0x119   :  { %2054 = vmatprep.subr.bf16.mxu1 %v2344_v23 }
 0x11a   :  { %617 = vperm.xlu1 %2331, %v596_v48   ;;  %620 = vperm.xlu0 %2320, %v597_v49  }
 0x11c   :  { %2055 = vmatpush3.bf16.msra.mxu1 %v2345_v24 }
 0x11d   :  { %2056 = vmatprep.subr.bf16.mxu1 %v2346_v25 }
 0x11e   :  { %623 = vperm.xlu1 %2331, %v598_v51   ;;  %626 = vperm.xlu0 %2320, %v599_v52  }
 0x120   :  { %2057 = vmatpush3.bf16.msra.mxu1 %v2347_v26 }
 0x121   :  { %2058 = vmatprep.subr.bf16.mxu1 %v2348_v27 }
 0x122   :  { %629 = vperm.xlu1 %2331, %v600_v54   ;;  %632 = vperm.xlu0 %2320, %v601_v55  }
 0x126   :  { %635 = vperm.xlu1 %2331, %v602_v57   ;;  %638 = vperm.xlu0 %2320, %v603_v58  }
 0x12a   :  { %641 = vperm.xlu1 %2331, %v604_v60   ;;  %644 = vperm.xlu0 %2320, %v605_v61  }
 0x12e   :  { %647 = vperm.xlu1 %2331, %v606_v63   ;;  %650 = vperm.xlu0 %2320, %v607_v0  }
 0x132   :  { %653 = vperm.xlu1 %2331, %v608_v2   ;;  %656 = vperm.xlu0 %2320, %v609_v3  }
 0x136   :  { %659 = vperm.xlu1 %2331, %v610_v6  }
 0x184   :  { %v2323_v28 = vpop.permute.xlu1 %2322  ;;  %v2317_v29 = vpop.permute.xlu0 %2316 }
 0x185   :  { %v2319_v31 = vunpack.i.h.bf16 %v2317_v29  ;;  %v2318_v32 = vunpack.i.l.bf16 %v2317_v29  ;;  %v2325_v33 = vunpack.i.h.bf16 %v2323_v28  ;;  %v2324_v34 = vunpack.i.l.bf16 %v2323_v28 }
 0x187   :  { %v348_v35 = vsel %vm188_vm1, %v2643_v37, %v2319_v31  ;;  %v347_v36 = vsel %vm188_vm1, %v2629_v30, %v2318_v32  ;;  %v1904_v37 = vld [vmem:[%s3105_s8] ss:$0 sm:$0xff]  ;;  %v226_v30 = vpop.f32.mrb[0].mxu1 }
 0x188   :  { %v2328_v38 = vpop.permute.xlu1 %2327  ;;  %v350_v41 = vsel %vm349_vm3, %v347_v36, %v2324_v34  ;;  %v351_v42 = vsel %vm349_vm3, %v348_v35, %v2325_v33  ;;  %v227_v48 = vadd.f32 %v1904_v37, %v226_v30  ;;  %v2160_v49 = vpop.f32.mrb[1].mxu1  ;;  %v2349_v35 = vld [vmem:[%s3108_s11 + $0x30] sm:$0xff]  }
 0x189   :  { %v2330_v39 = vunpack.i.h.bf16 %v2328_v38  ;;  %v2329_v40 = vunpack.i.l.bf16 %v2328_v38  ;;  %v229_v50 = vpop.f32.mrb[2].mxu1  ;;  %2059 = vmatpush3.bf16.msra.mxu1 %v2349_v35 }
 0x18a   :  { %v1908_v52 = vmul.f32 -1.442695, %v227_v48  ;;  %v230_v53 = vadd.f32 %v1904_v37, %v229_v50  ;;  %v2161_v54 = vpop.f32.mrb[3].mxu1 }
 0x18b   :  { %v353_v43 = vsel %vm352_vm4, %v350_v41, %v2329_v40  ;;  %v354_v44 = vsel %vm352_vm4, %v351_v42, %v2330_v39  ;;  %v500_v33 = vpop.f32.mrb[4].mxu1  ;;  %v2350_v39 = vld [vmem:[%s3108_s11 + $0x78] sm:$0xff]  }
 0x18c   :  { %v2269_v45 = vpack.c.bf16 %v354_v44, %v353_v43  ;;  %2374 = vpow2.f32 %v1908_v52  ;;  %v1909_v56 = vmul.f32 -1.442695, %v230_v53  ;;  %v502_v34 = vpop.f32.mrb[5].mxu1  ;;  %v2351_v40 = vld [vmem:[%s3108_s11 + $0x38] sm:$0xff]   ;;  %2060 = vmatprep.subr.bf16.mxu1 %v2350_v39  ;;  %s3140_s11 = sld [smem:[#allocation14_spill]] }
 0x18d   :  { %v506_v36 = vpop.f32.mrb[6].mxu1  ;;  %2061 = vmatpush3.bf16.msra.mxu1 %v2351_v40 }
 0x18e   :  { %2270 = vmatprep.subr.bf16.mxu0 %v2269_v45  ;;  %2376 = vpow2.f32 %v1909_v56  ;;  %v508_v38 = vpop.f32.mrb[7].mxu1 }
 0x18f   :  { %2272 = vmatpush1.bf16.msra.mxu0 %v2269_v45  ;;  %v512_v41 = vpop.f32.mrb[8].mxu1 }
 0x190   :  { %v514_v42 = vpop.f32.mrb[9].mxu1 }
 0x191   :  { %v518_v43 = vpop.f32.mrb[10].mxu1 }
 0x192   :  { %v520_v44 = vpop.f32.mrb[11].mxu1 }
 0x193   :  { %v524_v45 = vpop.f32.mrb[12].mxu1 }
 0x194   :  { %v526_v37 = vpop.f32.mrb[13].mxu1 }
 0x195   :  { %v615_v51 = vpop.permute.xlu0 %614 }
 0x196   :  { %vm661_vm6 = vcmp.eq.s32.totalorder %v615_v51, %v2833_v47  ;;  %v2375_v62 = vpop.eup %2374 }
 0x197   :  { %v1932_v55 = vsel %vm661_vm6, 1.0, %v2462_v5  ;;  %v239_v0 = vadd.f32 1.0, %v2375_v62 }
 0x198   :  { %1948 = vmatmul.mubr.msk.f32.vlgmr.msra.gmra.mrb[2].mxu0 %vm713_vm5, %v1932_v55  ;;  %v2377_v1 = vpop.eup %2376 }
 0x199   :  { %v618_v57 = vpop.permute.xlu1 %617  ;;  %v621_v58 = vpop.permute.xlu0 %620  ;;  %832 = vmatprep.mubr.f32.mxu0 %v2462_v5  ;;  %2378 = vrcp.f32 %v239_v0  ;;  %v240_v3 = vadd.f32 1.0, %v2377_v1 }
 0x19a   :  { %vm662_vm7 = vcmp.eq.s32.totalorder %v618_v57, %v2833_v47  ;;  %vm663_vm8 = vcmp.eq.s32.totalorder %v621_v58, %v2833_v47 }
 0x19b   :  { %v1933_v59 = vsel %vm662_vm7, 1.0, %v2462_v5  ;;  %v1934_v61 = vsel %vm663_vm8, 1.0, %v2462_v5  ;;  %2380 = vrcp.f32 %v240_v3 }
 0x19c   :  { %1949 = vmatmul.mubr.msk.f32.gmra.mrb[8].mxu0 %vm713_vm5, %v1933_v59 }
 0x19d   :  { %v624_v60 = vpop.permute.xlu1 %623  ;;  %838 = vmatprep.mubr.f32.mxu0 %v2462_v5  ;;  %v627_v63 = vpop.permute.xlu0 %626 }
 0x19e   :  { %vm664_vm9 = vcmp.eq.s32.totalorder %v624_v60, %v2833_v47  ;;  %vm665_vm10 = vcmp.eq.s32.totalorder %v627_v63, %v2833_v47 }
 0x19f   :  { %v1935_v2 = vsel %vm664_vm9, 1.0, %v2462_v5  ;;  %v1936_v6 = vsel %vm665_vm10, 1.0, %v2462_v5 }
 0x1a0   :  { %1950 = vmatmul.mubr.msk.f32.gmra.mrb[10].mxu0 %vm713_vm5, %v1934_v61 }
 0x1a1   :  { %844 = vmatprep.mubr.f32.mxu0 %v2462_v5  ;;  %v630_v4 = vpop.permute.xlu1 %629  ;;  %v633_v7 = vpop.permute.xlu0 %632 }
 0x1a2   :  { %vm666_vm11 = vcmp.eq.s32.totalorder %v630_v4, %v2833_v47  ;;  %vm667_vm12 = vcmp.eq.s32.totalorder %v633_v7, %v2833_v47 }
 0x1a3   :  { %v1937_v8 = vsel %vm666_vm11, 1.0, %v2462_v5  ;;  %v2379_v10 = vpop.eup %2378  ;;  %v1938_v11 = vsel %vm667_vm12, 1.0, %v2462_v5 }
 0x1a4   :  { %1951 = vmatmul.mubr.msk.f32.gmra.mrb[12].mxu0 %vm713_vm5, %v1935_v2  ;;  %v245_v12 = vmul.f32 %v2379_v10, %v227_v48 }
 0x1a5   :  { %850 = vmatprep.mubr.f32.mxu0 %v2462_v5  ;;  %v636_v9 = vpop.permute.xlu1 %635  ;;  %v2381_v13 = vpop.eup %2380 }
 0x1a6   :  { %vm668_vm13 = vcmp.eq.s32.totalorder %v636_v9, %v2833_v47  ;;  %v639_v14 = vpop.permute.xlu0 %638  ;;  %359 = vst.msk [vmem:[#allocation3] sm:$0xff] %vm188_vm1, %v245_v12  ;;  %v246_v15 = vmul.f32 %v2381_v13, %v230_v53 }
 0x1a7   :  { %v1939_v16 = vsel %vm668_vm13, 1.0, %v2462_v5  ;;  %vm669_vm14 = vcmp.eq.s32.totalorder %v639_v14, %v2833_v47 }
 0x1a8   :  { %1952 = vmatmul.mubr.msk.f32.gmra.mrb[14].mxu0 %vm713_vm5, %v1936_v6  ;;  %360 = vst.msk [vmem:[#allocation3 + $0x8] sm:$0xff] %vm188_vm1, %v246_v15  ;;  %v1940_v18 = vsel %vm669_vm14, 1.0, %v2462_v5 }
 0x1a9   :  { %856 = vmatprep.mubr.f32.mxu0 %v2462_v5  ;;  %v642_v17 = vpop.permute.xlu1 %641 }
 0x1aa   :  { %vm670_vm15 = vcmp.eq.s32.totalorder %v642_v17, %v2833_v47  ;;  %v645_v19 = vpop.permute.xlu0 %644 }
 0x1ab   :  { %v1941_v20 = vsel %vm670_vm15, 1.0, %v2462_v5  ;;  %vm671_vm0 = vcmp.eq.s32.totalorder %v645_v19, %v2833_v47 }
 0x1ac   :  { %1953 = vmatmul.mubr.msk.f32.gmra.mrb[16].mxu0 %vm713_vm5, %v1937_v8  ;;  %v1942_v22 = vsel %vm671_vm0, 1.0, %v2462_v5 }
 0x1ad   :  { %862 = vmatprep.mubr.f32.mxu0 %v2462_v5  ;;  %v648_v21 = vpop.permute.xlu1 %647 }
 0x1ae   :  { %vm672_vm3 = vcmp.eq.s32.totalorder %v648_v21, %v2833_v47  ;;  %v651_v23 = vpop.permute.xlu0 %650 }
 0x1af   :  { %v1943_v24 = vsel %vm672_vm3, 1.0, %v2462_v5  ;;  %vm673_vm4 = vcmp.eq.s32.totalorder %v651_v23, %v2833_v47 }
 0x1b0   :  { %1954 = vmatmul.mubr.msk.f32.gmra.mrb[18].mxu0 %vm713_vm5, %v1938_v11  ;;  %v1944_v26 = vsel %vm673_vm4, 1.0, %v2462_v5 }
 0x1b1   :  { %868 = vmatprep.mubr.f32.mxu0 %v2462_v5  ;;  %v654_v25 = vpop.permute.xlu1 %653 }
 0x1b2   :  { %vm674_vm6 = vcmp.eq.s32.totalorder %v654_v25, %v2833_v47  ;;  %v657_v27 = vpop.permute.xlu0 %656 }
 0x1b3   :  { %v1945_v28 = vsel %vm674_vm6, 1.0, %v2462_v5  ;;  %vm675_vm7 = vcmp.eq.s32.totalorder %v657_v27, %v2833_v47 }
 0x1b4   :  { %1955 = vmatmul.mubr.msk.f32.gmra.mrb[20].mxu0 %vm713_vm5, %v1939_v16  ;;  %v1946_v31 = vsel %vm675_vm7, 1.0, %v2462_v5 }
 0x1b5   :  { %874 = vmatprep.mubr.f32.mxu0 %v2462_v5  ;;  %v660_v29 = vpop.permute.xlu1 %659 }
 0x1b6   :  { %vm676_vm8 = vcmp.eq.s32.totalorder %v660_v29, %v2833_v47  ;;  %v530_v47 = vpop.f32.mrb[14].mxu1 }
 0x1b7   :  { %v1947_v32 = vsel %vm676_vm8, 1.0, %v2462_v5  ;;  %v532_v30 = vpop.f32.mrb[15].mxu1 }
 0x1b8   :  { %1956 = vmatmul.mubr.msk.f32.gmra.mrb[22].mxu0 %vm713_vm5, %v1940_v18  ;;  %v536_v48 = vpop.f32.mrb[16].mxu1 }
 0x1b9   :  { %880 = vmatprep.mubr.f32.mxu0 %v2462_v5  ;;  %v538_v49 = vpop.f32.mrb[17].mxu1 }
 0x1ba   :  { %v542_v50 = vpop.f32.mrb[18].mxu1 }
 0x1bb   :  { %v544_v51 = vpop.f32.mrb[19].mxu1 }
 0x1bc   :  { %1957 = vmatmul.mubr.msk.f32.gmra.mrb[24].mxu0 %vm713_vm5, %v1941_v20  ;;  %v2909_v52 = vpop.f32.mrb[20].mxu1 }
 0x1bd   :  { %886 = vmatprep.mubr.f32.mxu0 %v2462_v5  ;;  %v2911_v53 = vpop.f32.mrb[21].mxu1 }
 0x1be   :  { %v2913_v54 = vpop.f32.mrb[22].mxu1 }
 0x1bf   :  { %v2915_v55 = vpop.f32.mrb[23].mxu1 }
 0x1c0   :  { %1958 = vmatmul.mubr.msk.f32.gmra.mrb[26].mxu0 %vm713_vm5, %v1942_v22  ;;  %v2917_v56 = vpop.f32.mrb[24].mxu1 }
 0x1c1   :  { %892 = vmatprep.mubr.f32.mxu0 %v2462_v5  ;;  %v2919_v57 = vpop.f32.mrb[25].mxu1 }
 0x1c2   :  { %v2921_v58 = vpop.f32.mrb[26].mxu1 }
 0x1c3   :  { %v2923_v59 = vpop.f32.mrb[27].mxu1 }
 0x1c4   :  { %1959 = vmatmul.mubr.msk.f32.gmra.mrb[28].mxu0 %vm713_vm5, %v1943_v24  ;;  %v2925_v60 = vpop.f32.mrb[28].mxu1 }
 0x1c5   :  { %898 = vmatprep.mubr.f32.mxu0 %v2462_v5  ;;  %v2927_v61 = vpop.f32.mrb[29].mxu1 }
 0x1c8   :  { %1960 = vmatmul.mubr.msk.f32.gmra.mrb[30].mxu0 %vm713_vm5, %v1944_v26 }
 0x1c9   :  { %904 = vmatprep.mubr.f32.mxu0 %v2462_v5 }
 0x1cc   :  { %1961 = vmatmul.mubr.msk.f32.gmra.mrb[32].mxu0 %vm713_vm5, %v1945_v28 }
 0x1cd   :  { %910 = vmatprep.mubr.f32.mxu0 %v2462_v5 }
 0x1d0   :  { %1962 = vmatmul.mubr.msk.f32.gmra.mrb[34].mxu0 %vm713_vm5, %v1946_v31 }
 0x1d1   :  { %916 = vmatprep.mubr.f32.mxu0 %v2462_v5 }
 0x1d4   :  { %1963 = vmatmul.mubr.msk.f32.gmra.mrb[36].mxu0 %vm713_vm5, %v1947_v32 }
 0x1e2   :  { %v2929_v62 = vpop.f32.mrb[30].mxu1 }
 0x1e3   :  { %v2931_v63 = vpop.f32.mrb[31].mxu1 }
 0x1e6   :  { %v2933_v0 = vpop.f32.mrb[32].mxu1 }
 0x1e7   :  { %v2935_v1 = vpop.f32.mrb[33].mxu1 }
 0x1ea   :  { %v2937_v2 = vpop.f32.mrb[34].mxu1 }
 0x1eb   :  { %v2939_v3 = vpop.f32.mrb[35].mxu1 }
 0x26b   :  { %v828_v4 = vpop.f32.mrb[2].mxu0 }
 0x26c   :  { %v923_v6 = vmul.f32 %v828_v4, %v500_v33  ;;  %v830_v7 = vpop.f32.mrb[3].mxu0 }
 0x26d   :  { %v924_v8 = vmul.f32 %v830_v7, %v502_v34 }
 0x26f   :  { %v834_v9 = vpop.f32.mrb[8].mxu0 }
 0x270   :  { %v925_v10 = vmul.f32 %v834_v9, %v506_v36  ;;  %v836_v11 = vpop.f32.mrb[9].mxu0 }
 0x271   :  { %v926_v12 = vmul.f32 %v836_v11, %v508_v38 }
 0x272   :  { %v955_v13 = vpack.c.bf16 %v925_v10, %v923_v6 }
 0x273   :  { %v956_v14 = vpack.c.bf16 %v926_v12, %v924_v8  ;;  %v840_v15 = vpop.f32.mrb[10].mxu0 }
 0x274   :  { %v927_v16 = vmul.f32 %v840_v15, %v512_v41  ;;  %v842_v17 = vpop.f32.mrb[11].mxu0 }
 0x275   :  { %v928_v18 = vmul.f32 %v842_v17, %v514_v42  ;;  %1131 = vmatprep.mubr.bf16.mxu1 %v956_v14 }
 0x276   :  { %1132 = vmatmul.mubr.bf16.vlgmr.msra.gmra.mrb[36].mxu1 %v955_v13 }
 0x277   :  { %v846_v19 = vpop.f32.mrb[12].mxu0 }
 0x278   :  { %v929_v20 = vmul.f32 %v846_v19, %v518_v43  ;;  %v848_v21 = vpop.f32.mrb[13].mxu0 }
 0x279   :  { %v930_v22 = vmul.f32 %v848_v21, %v520_v44 }
 0x27a   :  { %v957_v23 = vpack.c.bf16 %v929_v20, %v927_v16 }
 0x27b   :  { %v958_v24 = vpack.c.bf16 %v930_v22, %v928_v18  ;;  %v852_v25 = vpop.f32.mrb[14].mxu0 }
 0x27c   :  { %v931_v26 = vmul.f32 %v852_v25, %v524_v45  ;;  %v854_v27 = vpop.f32.mrb[15].mxu0 }
 0x27d   :  { %v932_v28 = vmul.f32 %v854_v27, %v526_v37  ;;  %1139 = vmatprep.mubr.bf16.mxu1 %v958_v24 }
 0x27e   :  { %1140 = vmatmul.mubr.bf16.gmra.mrb[40].mxu1 %v957_v23 }
 0x27f   :  { %v858_v29 = vpop.f32.mrb[16].mxu0 }
 0x280   :  { %v933_v31 = vmul.f32 %v858_v29, %v530_v47  ;;  %v860_v32 = vpop.f32.mrb[17].mxu0 }
 0x281   :  { %v934_v33 = vmul.f32 %v860_v32, %v532_v30 }
 0x282   :  { %v959_v34 = vpack.c.bf16 %v933_v31, %v931_v26 }
 0x283   :  { %v960_v35 = vpack.c.bf16 %v934_v33, %v932_v28  ;;  %v864_v36 = vpop.f32.mrb[18].mxu0 }
 0x284   :  { %v935_v38 = vmul.f32 %v864_v36, %v536_v48  ;;  %v866_v39 = vpop.f32.mrb[19].mxu0 }
 0x285   :  { %v936_v40 = vmul.f32 %v866_v39, %v538_v49  ;;  %1147 = vmatprep.mubr.bf16.mxu1 %v960_v35 }
 0x286   :  { %1148 = vmatmul.mubr.bf16.gmra.mrb[44].mxu1 %v959_v34 }
 0x287   :  { %v870_v41 = vpop.f32.mrb[20].mxu0 }
 0x288   :  { %v937_v42 = vmul.f32 %v870_v41, %v542_v50  ;;  %v872_v43 = vpop.f32.mrb[21].mxu0 }
 0x289   :  { %v938_v44 = vmul.f32 %v872_v43, %v544_v51 }
 0x28a   :  { %v961_v45 = vpack.c.bf16 %v937_v42, %v935_v38 }
 0x28b   :  { %v962_v37 = vpack.c.bf16 %v938_v44, %v936_v40  ;;  %v876_v4 = vpop.f32.mrb[22].mxu0 }
 0x28c   :  { %v939_v6 = vmul.f32 %v876_v4, %v2909_v52  ;;  %v878_v47 = vpop.f32.mrb[23].mxu0 }
 0x28d   :  { %v940_v30 = vmul.f32 %v878_v47, %v2911_v53  ;;  %1155 = vmatprep.mubr.bf16.mxu1 %v962_v37 }
 0x28e   :  { %1156 = vmatmul.mubr.bf16.gmra.mrb[48].mxu1 %v961_v45 }
 0x28f   :  { %v882_v7 = vpop.f32.mrb[24].mxu0 }
 0x290   :  { %v941_v48 = vmul.f32 %v882_v7, %v2913_v54  ;;  %v884_v49 = vpop.f32.mrb[25].mxu0 }
 0x291   :  { %v942_v8 = vmul.f32 %v884_v49, %v2915_v55 }
 0x292   :  { %v963_v9 = vpack.c.bf16 %v941_v48, %v939_v6 }
 0x293   :  { %v964_v50 = vpack.c.bf16 %v942_v8, %v940_v30  ;;  %v888_v10 = vpop.f32.mrb[26].mxu0 }
 0x294   :  { %v943_v51 = vmul.f32 %v888_v10, %v2917_v56  ;;  %v890_v11 = vpop.f32.mrb[27].mxu0 }
 0x295   :  { %v944_v12 = vmul.f32 %v890_v11, %v2919_v57  ;;  %1163 = vmatprep.mubr.bf16.mxu1 %v964_v50 }
 0x296   :  { %1164 = vmatmul.mubr.bf16.gmra.mrb[52].mxu1 %v963_v9 }
 0x297   :  { %v894_v52 = vpop.f32.mrb[28].mxu0 }
 0x298   :  { %v945_v53 = vmul.f32 %v894_v52, %v2921_v58  ;;  %v896_v13 = vpop.f32.mrb[29].mxu0 }
 0x299   :  { %v946_v14 = vmul.f32 %v896_v13, %v2923_v59 }
 0x29a   :  { %v965_v54 = vpack.c.bf16 %v945_v53, %v943_v51 }
 0x29b   :  { %v966_v15 = vpack.c.bf16 %v946_v14, %v944_v12  ;;  %v900_v16 = vpop.f32.mrb[30].mxu0 }
 0x29c   :  { %v947_v55 = vmul.f32 %v900_v16, %v2925_v60  ;;  %v902_v17 = vpop.f32.mrb[31].mxu0 }
 0x29d   :  { %v948_v18 = vmul.f32 %v902_v17, %v2927_v61  ;;  %1171 = vmatprep.mubr.bf16.mxu1 %v966_v15 }
 0x29e   :  { %1172 = vmatmul.mubr.bf16.gmra.mrb[56].mxu1 %v965_v54 }
 0x29f   :  { %v906_v56 = vpop.f32.mrb[32].mxu0 }
 0x2a0   :  { %v949_v57 = vmul.f32 %v906_v56, %v2929_v62  ;;  %v908_v19 = vpop.f32.mrb[33].mxu0 }
 0x2a1   :  { %v950_v20 = vmul.f32 %v908_v19, %v2931_v63  ;;  %v1198_v63 = vshrl.u32 %v611_v46, 7 }
 0x2a2   :  { %v967_v58 = vpack.c.bf16 %v949_v57, %v947_v55 }
 0x2a3   :  { %v968_v21 = vpack.c.bf16 %v950_v20, %v948_v18  ;;  %v912_v22 = vpop.f32.mrb[34].mxu0 }
 0x2a4   :  { %v951_v59 = vmul.f32 %v912_v22, %v2933_v0  ;;  %v914_v23 = vpop.f32.mrb[35].mxu0  ;;  %v2961_v0 = vld [vmem:[%s3139_s4] ss:$0 sm:$0xff] }
 0x2a5   :  { %v952_v24 = vmul.f32 %v914_v23, %v2935_v1  ;;  %1179 = vmatprep.mubr.bf16.mxu1 %v968_v21  ;;  %v2963_v1 = vadd.s32 8, %v1198_v63  ;;  %vm1204_vm5 = vcmp.eq.s32.totalorder %v1198_v63, %v2961_v0 }
 0x2a6   :  { %1180 = vmatmul.mubr.bf16.gmra.mrb[60].mxu1 %v967_v58 }
 0x2a7   :  { %v918_v60 = vpop.f32.mrb[36].mxu0  ;;  %vm1205_vm9 = vcmp.eq.s32.totalorder %v2963_v1, %v2961_v0  ;;  %v1210_v1 = vld [vmem:[#allocation3] sm:$0xff] }
 0x2a8   :  { %v953_v61 = vmul.f32 %v918_v60, %v2937_v2  ;;  %v920_v25 = vpop.f32.mrb[37].mxu0  ;;  %v2468_v2 = vmov 1.0  }
 0x2a9   :  { %v954_v26 = vmul.f32 %v920_v25, %v2939_v3  ;;  %2202 = vmatprep.mubr.msk.f32.mxu0 %vm1204_vm5, %v2468_v2 }
 0x2aa   :  { %v969_v62 = vpack.c.bf16 %v953_v61, %v951_v59 }
 0x2ab   :  { %v970_v27 = vpack.c.bf16 %v954_v26, %v952_v24  ;;  %v2352_v26 = vld [vmem:[%s3109_s12] sm:$0xff]  }
 0x2ad   :  { %1187 = vmatprep.mubr.bf16.mxu1 %v970_v27  ;;  %v1211_v27 = vld [vmem:[#allocation3 + $0x8] sm:$0xff] }
 0x2ae   :  { %1188 = vmatmul.mubr.bf16.gmra.mrb[64].mxu1 %v969_v62  ;;  %v2353_v62 = vld [vmem:[%s3109_s12 + $0x8] sm:$0xff]  }
 0x349   :  { %v2062_v3 = vpop.f32.mrb[36].mxu1 }
 0x34a   :  { %v2063_v28 = vpop.f32.mrb[37].mxu1 }
 0x34b   :  { %v2064_v29 = vadd.f32 %v2063_v28, %v2062_v3  ;;  %v2065_v31 = vpop.f32.mrb[38].mxu1 }
 0x34c   :  { %v2066_v46 = vpop.f32.mrb[39].mxu1 }
 0x34d   :  { %v2067_v32 = vadd.f32 %v2066_v46, %v2065_v31  ;;  %v2354_v46 = vld [vmem:[%s3111_s14] sm:$0xff]  }
 0x34f   :  { %v2273_v33 = vpack.c.bf16 %v2067_v32, %v2064_v29  ;;  %v2355_v32 = vld [vmem:[%s3111_s14 + $0x8] sm:$0xff]  }
 0x351   :  { %v2068_v34 = vpop.f32.mrb[40].mxu1  ;;  %2274 = vmatprep.subr.bf16.mxu0 %v2273_v33 }
 0x352   :  { %v2069_v35 = vpop.f32.mrb[41].mxu1  ;;  %2276 = vmatpush3.bf16.msra.mxu0 %v2273_v33  ;;  %v1985_v33 = vld [vmem:[%s3110_s13] ss:$0 sm:$0xff] }
 0x353   :  { %v2070_v36 = vadd.f32 %v2069_v35, %v2068_v34  ;;  %v2071_v38 = vpop.f32.mrb[42].mxu1 }
 0x354   :  { %v2072_v39 = vpop.f32.mrb[43].mxu1 }
 0x355   :  { %v2073_v40 = vadd.f32 %v2072_v39, %v2071_v38 }
 0x357   :  { %v2277_v41 = vpack.c.bf16 %v2073_v40, %v2070_v36 }
 0x359   :  { %v2074_v42 = vpop.f32.mrb[44].mxu1  ;;  %2278 = vmatprep.subr.bf16.mxu0 %v2277_v41 }
 0x35a   :  { %v2075_v43 = vpop.f32.mrb[45].mxu1  ;;  %2280 = vmatpush3.bf16.msra.mxu0 %v2277_v41 }
 0x35b   :  { %v2076_v44 = vadd.f32 %v2075_v43, %v2074_v42  ;;  %v2077_v45 = vpop.f32.mrb[46].mxu1 }
 0x35c   :  { %v2078_v37 = vpop.f32.mrb[47].mxu1 }
 0x35d   :  { %v2079_v4 = vadd.f32 %v2078_v37, %v2077_v45 }
 0x35f   :  { %v2281_v6 = vpack.c.bf16 %v2079_v4, %v2076_v44 }
 0x361   :  { %v2080_v47 = vpop.f32.mrb[48].mxu1  ;;  %2282 = vmatprep.subr.bf16.mxu0 %v2281_v6 }
 0x362   :  { %v2081_v30 = vpop.f32.mrb[49].mxu1  ;;  %2284 = vmatpush3.bf16.msra.mxu0 %v2281_v6 }
 0x363   :  { %v2082_v7 = vadd.f32 %v2081_v30, %v2080_v47  ;;  %v2083_v48 = vpop.f32.mrb[50].mxu1 }
 0x364   :  { %v2084_v49 = vpop.f32.mrb[51].mxu1 }
 0x365   :  { %v2085_v8 = vadd.f32 %v2084_v49, %v2083_v48  ;;  %v2356_v48 = vld [vmem:[%s3113_s16] sm:$0xff]   ;;  %v2357_v49 = vld [vmem:[%s3113_s16 + $0x8] sm:$0xff]  }
 0x367   :  { %v2285_v9 = vpack.c.bf16 %v2085_v8, %v2082_v7  ;;  %v1991_v8 = vld [vmem:[%s3112_s15] ss:$0 sm:$0xff] }
 0x369   :  { %v2086_v50 = vpop.f32.mrb[52].mxu1  ;;  %2286 = vmatprep.subr.bf16.mxu0 %v2285_v9 }
 0x36a   :  { %v2087_v10 = vpop.f32.mrb[53].mxu1  ;;  %2288 = vmatpush3.bf16.msra.mxu0 %v2285_v9 }
 0x36b   :  { %v2088_v51 = vadd.f32 %v2087_v10, %v2086_v50  ;;  %v2089_v11 = vpop.f32.mrb[54].mxu1 }
 0x36c   :  { %v2090_v12 = vpop.f32.mrb[55].mxu1 }
 0x36d   :  { %v2091_v52 = vadd.f32 %v2090_v12, %v2089_v11 }
 0x36f   :  { %v2289_v53 = vpack.c.bf16 %v2091_v52, %v2088_v51 }
 0x371   :  { %v2092_v13 = vpop.f32.mrb[56].mxu1  ;;  %2290 = vmatprep.subr.bf16.mxu0 %v2289_v53 }
 0x372   :  { %v2093_v14 = vpop.f32.mrb[57].mxu1  ;;  %2292 = vmatpush3.bf16.msra.mxu0 %v2289_v53 }
 0x373   :  { %v2094_v54 = vadd.f32 %v2093_v14, %v2092_v13  ;;  %v2095_v15 = vpop.f32.mrb[58].mxu1 }
 0x374   :  { %v2096_v16 = vpop.f32.mrb[59].mxu1 }
 0x375   :  { %v2097_v55 = vadd.f32 %v2096_v16, %v2095_v15 }
 0x377   :  { %v2293_v17 = vpack.c.bf16 %v2097_v55, %v2094_v54 }
 0x379   :  { %v2098_v18 = vpop.f32.mrb[60].mxu1  ;;  %2294 = vmatprep.subr.bf16.mxu0 %v2293_v17 }
 0x37a   :  { %v2099_v56 = vpop.f32.mrb[61].mxu1  ;;  %2296 = vmatpush3.bf16.msra.mxu0 %v2293_v17 }
 0x37b   :  { %v2100_v57 = vadd.f32 %v2099_v56, %v2098_v18  ;;  %v2101_v19 = vpop.f32.mrb[62].mxu1 }
 0x37c   :  { %v2102_v20 = vpop.f32.mrb[63].mxu1 }
 0x37d   :  { %v2103_v58 = vadd.f32 %v2102_v20, %v2101_v19  ;;  %v2358_v20 = vld [vmem:[%s3115_s18] sm:$0xff]  }
 0x37f   :  { %v2297_v21 = vpack.c.bf16 %v2103_v58, %v2100_v57  ;;  %v2359_v58 = vld [vmem:[%s3115_s18 + $0x8] sm:$0xff]  }
 0x381   :  { %v2104_v22 = vpop.f32.mrb[64].mxu1  ;;  %2298 = vmatprep.subr.bf16.mxu0 %v2297_v21 }
 0x382   :  { %v2105_v59 = vpop.f32.mrb[65].mxu1  ;;  %2300 = vmatpush3.bf16.msra.mxu0 %v2297_v21  ;;  %v1997_v21 = vld [vmem:[%s3140_s11] ss:$0 sm:$0xff] }
 0x383   :  { %v2106_v23 = vadd.f32 %v2105_v59, %v2104_v22  ;;  %v2107_v24 = vpop.f32.mrb[66].mxu1 }
 0x384   :  { %v2108_v60 = vpop.f32.mrb[67].mxu1 }
 0x385   :  { %v2109_v61 = vadd.f32 %v2108_v60, %v2107_v24 }
 0x387   :  { %v2301_v25 = vpack.c.bf16 %v2109_v61, %v2106_v23 }
 0x389   :  { %2302 = vmatprep.subr.bf16.mxu0 %v2301_v25 }
 0x38a   :  { %2304 = vmatpush3.bf16.msra.mxu0 %v2301_v25 }
 0x38b   :  { %2205 = vmatprep.subr.bf16.mxu0 %v2462_v5 }
 0x38d   :  { %2203 = vmatmul.mubr.msk.f32.vlgmr.msra.gmra.mrb[38].mxu0 %vm1205_vm9, %v2468_v2 }
 0x38e   :  { %2209 = vmatprep.mubr.msk.bf16.mxu0 %vm2463_vm2, %v2462_v5  ;;  %2206 = vmatpush3.bf16.msra.mxu0 %v2352_v26 }
 0x38f   :  { %2207 = vmatprep.subr.bf16.mxu0 %v2462_v5 }
 0x392   :  { %2208 = vmatpush3.bf16.msra.mxu0 %v2353_v62 }
 0x393   :  { %2213 = vmatprep.subr.bf16.mxu0 %v2462_v5 }
 0x460   :  { %v2204_v63 = vpop.f32.mrb[38].mxu0 }
 0x461   :  { %v1288_v0 = vadd.f32 %v2204_v63, %v1211_v27  ;;  %v1278_v2 = vpop.f32.mrb[39].mxu0 }
 0x462   :  { %v1287_v3 = vadd.f32 %v1278_v2, %v1210_v1 }
 0x463   :  { %1290 = vst.msk [vmem:[#allocation3 + $0x8] sm:$0xff] %vm188_vm1, %v1288_v0 }
 0x464   :  { %1289 = vst.msk [vmem:[#allocation3] sm:$0xff] %vm188_vm1, %v1287_v3 }
 0x46a   :  { %v2986_v28 = vld [vmem:[#allocation3 + $0x8] sm:$0xff] }
 0x46b   :  { %v1294_v29 = vld [vmem:[#allocation3] sm:$0xff] }
 0x46c   :  { %v1296_v31 = vpack.c.bf16 %v2986_v28, %v1294_v29 }
 0x46e   :  { %2210 = vmatmul.mubr.msk.bf16.vlgmr.msra.gmra.mrb[40].mxu0 %vm188_vm1, %v1296_v31 }
 0x46f   :  { %2217 = vmatprep.mubr.msk.bf16.mxu0 %vm2463_vm2, %v2462_v5  ;;  %2214 = vmatpush3.bf16.msra.mxu0 %v2354_v46 }
 0x470   :  { %2215 = vmatprep.subr.bf16.mxu0 %v2462_v5 }
 0x473   :  { %2216 = vmatpush3.bf16.msra.mxu0 %v2355_v32 }
 0x474   :  { %2221 = vmatprep.subr.bf16.mxu0 %v2462_v5 }
 0x541   :  { %v1357_v34 = vpop.f32.mrb[40].mxu0 }
 0x542   :  { %v1358_v35 = vadd.f32 %v1985_v33, %v1357_v34  ;;  %v2211_v36 = vpop.f32.mrb[41].mxu0  ;;  %v2360_v34 = vld [vmem:[%s3117_s20] sm:$0xff]  }
 0x543   :  { %v1360_v38 = vpop.f32.mrb[42].mxu0  ;;  %v2003_v36 = vld [vmem:[%s3116_s19] ss:$0 sm:$0xff] }
 0x544   :  { %v1989_v39 = vmul.f32 -1.442695, %v1358_v35  ;;  %v1361_v40 = vadd.f32 %v1985_v33, %v1360_v38  ;;  %v2212_v41 = vpop.f32.mrb[43].mxu0 }
 0x546   :  { %2382 = vpow2.f32 %v1989_v39  ;;  %v1990_v42 = vmul.f32 -1.442695, %v1361_v40 }
 0x548   :  { %2384 = vpow2.f32 %v1990_v42 }
 0x550   :  { %v2383_v43 = vpop.eup %2382 }
 0x551   :  { %v1370_v44 = vadd.f32 1.0, %v2383_v43 }
 0x552   :  { %v2385_v45 = vpop.eup %2384 }
 0x553   :  { %2386 = vrcp.f32 %v1370_v44  ;;  %v1371_v37 = vadd.f32 1.0, %v2385_v45 }
 0x555   :  { %2388 = vrcp.f32 %v1371_v37 }
 0x55d   :  { %v2387_v4 = vpop.eup %2386 }
 0x55e   :  { %v1376_v47 = vmul.f32 %v2387_v4, %v1358_v35  ;;  %v2361_v35 = vld [vmem:[%s3117_s20 + $0x8] sm:$0xff]  }
 0x55f   :  { %v2389_v6 = vpop.eup %2388 }
 0x560   :  { %v1377_v30 = vmul.f32 %v2389_v6, %v1361_v40 }
 0x562   :  { %v1378_v7 = vpack.c.bf16 %v1377_v30, %v1376_v47 }
 0x564   :  { %2218 = vmatmul.mubr.msk.bf16.vlgmr.msra.gmra.mrb[44].mxu0 %vm188_vm1, %v1378_v7 }
 0x565   :  { %2225 = vmatprep.mubr.msk.bf16.mxu0 %vm2463_vm2, %v2462_v5  ;;  %2222 = vmatpush3.bf16.msra.mxu0 %v2356_v48 }
 0x566   :  { %2223 = vmatprep.subr.bf16.mxu0 %v2462_v5 }
 0x569   :  { %2224 = vmatpush3.bf16.msra.mxu0 %v2357_v49 }
 0x56a   :  { %2229 = vmatprep.subr.bf16.mxu0 %v2462_v5 }
 0x637   :  { %v1439_v9 = vpop.f32.mrb[44].mxu0 }
 0x638   :  { %v1440_v50 = vadd.f32 %v1991_v8, %v1439_v9  ;;  %v2219_v10 = vpop.f32.mrb[45].mxu0  ;;  %v2362_v9 = vld [vmem:[%s3115_s18 + $0x10] sm:$0xff]  }
 0x639   :  { %v1442_v51 = vpop.f32.mrb[46].mxu0  ;;  %v2009_v10 = vld [vmem:[%s3118_s21] ss:$0 sm:$0xff] }
 0x63a   :  { %v1995_v11 = vmul.f32 -1.442695, %v1440_v50  ;;  %v1443_v12 = vadd.f32 %v1991_v8, %v1442_v51  ;;  %v2220_v52 = vpop.f32.mrb[47].mxu0 }
 0x63c   :  { %2390 = vpow2.f32 %v1995_v11  ;;  %v1996_v53 = vmul.f32 -1.442695, %v1443_v12 }
 0x63e   :  { %2392 = vpow2.f32 %v1996_v53 }
 0x646   :  { %v2391_v13 = vpop.eup %2390 }
 0x647   :  { %v1452_v14 = vadd.f32 1.0, %v2391_v13 }
 0x648   :  { %v2393_v54 = vpop.eup %2392 }
 0x649   :  { %2394 = vrcp.f32 %v1452_v14  ;;  %v1453_v15 = vadd.f32 1.0, %v2393_v54 }
 0x64b   :  { %2396 = vrcp.f32 %v1453_v15 }
 0x653   :  { %v2395_v16 = vpop.eup %2394 }
 0x654   :  { %v1458_v55 = vmul.f32 %v2395_v16, %v1440_v50  ;;  %v2363_v50 = vld [vmem:[%s3115_s18 + $0x18] sm:$0xff]  }
 0x655   :  { %v2397_v17 = vpop.eup %2396 }
 0x656   :  { %v1459_v18 = vmul.f32 %v2397_v17, %v1443_v12  ;;  %v1460_v56 = vadd.f32 %v1458_v55, %v1294_v29  ;;  %v1545_v29 = vld [vmem:[%s3135_s17 + $0x8] sm:$0xff] }
 0x658   :  { %v1461_v57 = vadd.f32 %v1459_v18, %v2986_v28  ;;  %v1544_v28 = vld [vmem:[%s3135_s17] sm:$0xff] }
 0x65a   :  { %v1462_v19 = vpack.c.bf16 %v1461_v57, %v1460_v56 }
 0x65c   :  { %2226 = vmatmul.mubr.msk.bf16.vlgmr.msra.gmra.mrb[48].mxu0 %vm188_vm1, %v1462_v19 }
 0x65d   :  { %2233 = vmatprep.mubr.msk.bf16.mxu0 %vm2463_vm2, %v2462_v5  ;;  %2230 = vmatpush3.bf16.msra.mxu0 %v2358_v20 }
 0x65e   :  { %2231 = vmatprep.subr.bf16.mxu0 %v2462_v5 }
 0x661   :  { %2232 = vmatpush3.bf16.msra.mxu0 %v2359_v58 }
 0x662   :  { %2237 = vmatprep.subr.bf16.mxu0 %v2462_v5 }
 0x72f   :  { %v1523_v22 = vpop.f32.mrb[48].mxu0 }
 0x730   :  { %v1524_v59 = vadd.f32 %v1997_v21, %v1523_v22  ;;  %v2227_v23 = vpop.f32.mrb[49].mxu0  ;;  %v2364_v22 = vld [vmem:[%s3117_s20 + $0x10] sm:$0xff]  }
 0x731   :  { %v1526_v24 = vpop.f32.mrb[50].mxu0  ;;  %v2020_v23 = vld [vmem:[%s3116_s19 + $0x1] ss:$0 sm:$0xff] }
 0x732   :  { %v2001_v60 = vmul.f32 -1.442695, %v1524_v59  ;;  %v1527_v61 = vadd.f32 %v1997_v21, %v1526_v24  ;;  %v2228_v25 = vpop.f32.mrb[51].mxu0 }
 0x734   :  { %2398 = vpow2.f32 %v2001_v60  ;;  %v2002_v26 = vmul.f32 -1.442695, %v1527_v61 }
 0x736   :  { %2400 = vpow2.f32 %v2002_v26 }
 0x73e   :  { %v2399_v62 = vpop.eup %2398 }
 0x73f   :  { %v1536_v27 = vadd.f32 1.0, %v2399_v62 }
 0x740   :  { %v2401_v63 = vpop.eup %2400 }
 0x741   :  { %2402 = vrcp.f32 %v1536_v27  ;;  %v1537_v0 = vadd.f32 1.0, %v2401_v63 }
 0x743   :  { %2404 = vrcp.f32 %v1537_v0 }
 0x74b   :  { %v2403_v1 = vpop.eup %2402 }
 0x74c   :  { %v1542_v2 = vmul.f32 %v2403_v1, %v1524_v59  ;;  %v2365_v59 = vld [vmem:[%s3117_s20 + $0x18] sm:$0xff]  }
 0x74d   :  { %v2405_v3 = vpop.eup %2404 }
 0x74e   :  { %v1543_v31 = vmul.f32 %v2405_v3, %v1527_v61  ;;  %v1546_v46 = vadd.f32 %v1544_v28, %v1542_v2 }
 0x750   :  { %v1547_v32 = vadd.f32 %v1545_v29, %v1543_v31 }
 0x752   :  { %v1548_v33 = vpack.c.bf16 %v1547_v32, %v1546_v46 }
 0x754   :  { %2234 = vmatmul.mubr.msk.bf16.vlgmr.msra.gmra.mrb[52].mxu0 %vm188_vm1, %v1548_v33 }
 0x755   :  { %2241 = vmatprep.mubr.msk.bf16.mxu0 %vm2463_vm2, %v2462_v5  ;;  %2238 = vmatpush3.bf16.msra.mxu0 %v2360_v34 }
 0x756   :  { %2239 = vmatprep.subr.bf16.mxu0 %v2462_v5 }
 0x759   :  { %2240 = vmatpush3.bf16.msra.mxu0 %v2361_v35 }
 0x75a   :  { %2245 = vmatprep.subr.bf16.mxu0 %v2462_v5 }
 0x827   :  { %v1609_v38 = vpop.f32.mrb[52].mxu0 }
 0x828   :  { %v1610_v39 = vadd.f32 %v2003_v36, %v1609_v38  ;;  %v2235_v40 = vpop.f32.mrb[53].mxu0 }
 0x829   :  { %v1612_v41 = vpop.f32.mrb[54].mxu0 }
 0x82a   :  { %v2007_v42 = vmul.f32 -1.442695, %v1610_v39  ;;  %v1613_v43 = vadd.f32 %v2003_v36, %v1612_v41  ;;  %v2236_v44 = vpop.f32.mrb[55].mxu0 }
 0x82c   :  { %2406 = vpow2.f32 %v2007_v42  ;;  %v2008_v45 = vmul.f32 -1.442695, %v1613_v43 }
 0x82e   :  { %2408 = vpow2.f32 %v2008_v45 }
 0x836   :  { %v2407_v37 = vpop.eup %2406 }
 0x837   :  { %v1622_v4 = vadd.f32 1.0, %v2407_v37 }
 0x838   :  { %v2409_v6 = vpop.eup %2408 }
 0x839   :  { %2410 = vrcp.f32 %v1622_v4  ;;  %v1623_v47 = vadd.f32 1.0, %v2409_v6 }
 0x83b   :  { %2412 = vrcp.f32 %v1623_v47 }
 0x843   :  { %v2411_v30 = vpop.eup %2410 }
 0x844   :  { %v1628_v48 = vmul.f32 %v2411_v30, %v1610_v39 }
 0x845   :  { %v2413_v7 = vpop.eup %2412 }
 0x846   :  { %v1629_v49 = vmul.f32 %v2413_v7, %v1613_v43 }
 0x848   :  { %v1630_v8 = vpack.c.bf16 %v1629_v49, %v1628_v48 }
 0x84a   :  { %2242 = vmatmul.mubr.msk.bf16.vlgmr.msra.gmra.mrb[56].mxu0 %vm188_vm1, %v1630_v8 }
 0x84b   :  { %2249 = vmatprep.mubr.msk.bf16.mxu0 %vm2463_vm2, %v2462_v5  ;;  %2246 = vmatpush3.bf16.msra.mxu0 %v2362_v9 }
 0x84c   :  { %2247 = vmatprep.subr.bf16.mxu0 %v2462_v5 }
 0x84f   :  { %2248 = vmatpush3.bf16.msra.mxu0 %v2363_v50 }
 0x850   :  { %2253 = vmatprep.subr.bf16.mxu0 %v2462_v5 }
 0x91d   :  { %v1691_v51 = vpop.f32.mrb[56].mxu0 }
 0x91e   :  { %v1692_v11 = vadd.f32 %v2009_v10, %v1691_v51  ;;  %v2243_v12 = vpop.f32.mrb[57].mxu0 }
 0x91f   :  { %v1694_v52 = vpop.f32.mrb[58].mxu0 }
 0x920   :  { %v2013_v53 = vmul.f32 -1.442695, %v1692_v11  ;;  %v1695_v13 = vadd.f32 %v2009_v10, %v1694_v52  ;;  %v2244_v14 = vpop.f32.mrb[59].mxu0 }
 0x922   :  { %2414 = vpow2.f32 %v2013_v53  ;;  %v2014_v54 = vmul.f32 -1.442695, %v1695_v13 }
 0x924   :  { %2416 = vpow2.f32 %v2014_v54 }
 0x92c   :  { %v2415_v15 = vpop.eup %2414 }
 0x92d   :  { %v1704_v16 = vadd.f32 1.0, %v2415_v15 }
 0x92e   :  { %v2417_v55 = vpop.eup %2416 }
 0x92f   :  { %2418 = vrcp.f32 %v1704_v16  ;;  %v1705_v17 = vadd.f32 1.0, %v2417_v55 }
 0x931   :  { %2420 = vrcp.f32 %v1705_v17 }
 0x939   :  { %v2419_v18 = vpop.eup %2418 }
 0x93a   :  { %v1710_v56 = vmul.f32 %v2419_v18, %v1692_v11 }
 0x93b   :  { %v2421_v57 = vpop.eup %2420 }
 0x93c   :  { %v1711_v19 = vmul.f32 %v2421_v57, %v1695_v13  ;;  %v1712_v20 = vadd.f32 %v1710_v56, %v1546_v46 }
 0x93e   :  { %v1713_v58 = vadd.f32 %v1711_v19, %v1547_v32  ;;  %v2031_v32 = vld [vmem:[%s3118_s21 + $0x1] ss:$0 sm:$0xff]  ;;  %s1891_s21 = sshll.u32 %s2469_s9, 4  ;;  %s1892_s21 = int_to_ptr.vmem [resolvable:$true] %s1891_s21 }
 0x93f   :  { %s2438_s3 = scalar_lea.vmem %s1892_s21, 256  ;;  %p2443_p1 = scmp.lt.s32.totalorder %s1892_s21, %s1892_s21 }
 0x940   :  { %v1714_v21 = vpack.c.bf16 %v1713_v58, %v1712_v20  ;;  %p2439_p0 = scmp.ne.s32.totalorder %s1892_s21, %s2438_s3  ;;  %p2444_p2 = scmp.lt.s32.totalorder %s2438_s3, %s2438_s3 }
 0x942   :  { %2250 = vmatmul.mubr.msk.bf16.vlgmr.msra.gmra.mrb[60].mxu0 %vm188_vm1, %v1714_v21  ;;  %p2445_p3 = por %p2444_p2, %p2443_p1 }
 0x943   :  { %2257 = vmatprep.mubr.msk.bf16.mxu0 %vm2463_vm2, %v2462_v5  ;;  %2254 = vmatpush3.bf16.msra.mxu0 %v2364_v22 }
 0x944   :  { %2255 = vmatprep.subr.bf16.mxu0 %v2462_v5  ;;  %p2446_p4 = pnand %p2445_p3, %p2439_p0 }
 0x947   :  { %2256 = vmatpush3.bf16.msra.mxu0 %v2365_v59 }
 0xa15   :  { %v1777_v24 = vpop.f32.mrb[60].mxu0 }
 0xa16   :  { %v1778_v60 = vadd.f32 %v2020_v23, %v1777_v24  ;;  %v2251_v61 = vpop.f32.mrb[61].mxu0 }
 0xa17   :  { %v1780_v25 = vpop.f32.mrb[62].mxu0 }
 0xa18   :  { %v2024_v26 = vmul.f32 -1.442695, %v1778_v60  ;;  %v1781_v62 = vadd.f32 %v2020_v23, %v1780_v25  ;;  %v2252_v27 = vpop.f32.mrb[63].mxu0 }
 0xa1a   :  { %2422 = vpow2.f32 %v2024_v26  ;;  %v2025_v63 = vmul.f32 -1.442695, %v1781_v62 }
 0xa1c   :  { %2424 = vpow2.f32 %v2025_v63 }
 0xa24   :  { %v2423_v5 = vpop.eup %2422 }
 0xa25   :  { %v1790_v0 = vadd.f32 1.0, %v2423_v5 }
 0xa26   :  { %v2425_v1 = vpop.eup %2424 }
 0xa27   :  { %2426 = vrcp.f32 %v1790_v0  ;;  %v1791_v2 = vadd.f32 1.0, %v2425_v1 }
 0xa29   :  { %2428 = vrcp.f32 %v1791_v2 }
 0xa31   :  { %v2427_v3 = vpop.eup %2426 }
 0xa32   :  { %v1796_v29 = vmul.f32 %v2427_v3, %v1778_v60 }
 0xa33   :  { %v2429_v28 = vpop.eup %2428 }
 0xa34   :  { %v1797_v31 = vmul.f32 %v2429_v28, %v1781_v62 }
 0xa36   :  { %v1798_v46 = vpack.c.bf16 %v1797_v31, %v1796_v29 }
 0xa38   :  { %2258 = vmatmul.mubr.msk.bf16.vlgmr.msra.gmra.mrb[64].mxu0 %vm188_vm1, %v1798_v46 }
 0xb0b   :  { %v1861_v33 = vpop.f32.mrb[64].mxu0 }
 0xb0c   :  { %v1862_v34 = vadd.f32 %v2031_v32, %v1861_v33  ;;  %v2259_v35 = vpop.f32.mrb[65].mxu0 }
 0xb0d   :  { %v1864_v36 = vpop.f32.mrb[66].mxu0 }
 0xb0e   :  { %v2035_v38 = vmul.f32 -1.442695, %v1862_v34  ;;  %v1865_v39 = vadd.f32 %v2031_v32, %v1864_v36  ;;  %v2260_v40 = vpop.f32.mrb[67].mxu0 }
 0xb10   :  { %2430 = vpow2.f32 %v2035_v38  ;;  %v2036_v41 = vmul.f32 -1.442695, %v1865_v39 }
 0xb12   :  { %2432 = vpow2.f32 %v2036_v41 }
 0xb1a   :  { %v2431_v42 = vpop.eup %2430 }
 0xb1b   :  { %v1874_v43 = vadd.f32 1.0, %v2431_v42 }
 0xb1c   :  { %v2433_v44 = vpop.eup %2432 }
 0xb1d   :  { %2434 = vrcp.f32 %v1874_v43  ;;  %v1875_v45 = vadd.f32 1.0, %v2433_v44 }
 0xb1f   :  { %2436 = vrcp.f32 %v1875_v45 }
 0xb27   :  { %v2435_v37 = vpop.eup %2434 }
 0xb28   :  { %v1880_v4 = vmul.f32 %v2435_v37, %v1862_v34 }
 0xb29   :  { %v2437_v6 = vpop.eup %2436 }
 0xb2a   :  { %v1882_v47 = vadd.f32 %v1880_v4, %v1712_v20  ;;  %v1881_v30 = vmul.f32 %v2437_v6, %v1865_v39 }
 0xb2c   :  { %1884 = vst.msk [vmem:[#allocation4] sm:$0xff] %vm188_vm1, %v1882_v47  ;;  %v1883_v7 = vadd.f32 %v1881_v30, %v1713_v58 }
 0xb2e   :  { %1885 = vst.msk [vmem:[#allocation4 + $0x8] sm:$0xff] %vm188_vm1, %v1883_v7 }
 0xb2f   :  { %2449 = shalt.err (!%p2446_p4)
}
 0xb30   :  { %s2450_s11 = scalar_lea.hbm %s3119_s22, 256 }
 0xb31   :  { %p2451_p5 = scmp.ne.s32.totalorder %s3119_s22, %s2450_s11  ;;  %p2454_p6 = scmp.lt.u32.totalorder %s2450_s11, %s3119_s22 }
 0xb33   :  { %p2456_p7 = pnand %p2454_p6, %p2451_p5 }
 0xb35   :  { %2459 = shalt.err (!%p2456_p7)
}
 0xb36   :  { %s2470_s23 = smov 128   ;;  %s2471_s5 = smov 8  }
 0xb37   :  { %1897 = dma.vmem_to_hbm [thread:$0]  %s1892_s21, 256, %s3119_s22, [#allocation5], %s2470_s23, %s2470_s23, %s2471_s5  }
 0xb38   :  { %2460 = dma.done.wait [#allocation5], 256  }
 0xb39   :  { %2461 = vsyncadd [#allocation5], 4294967040 }
 0xb3a   :  { %1901 = vsyncpa [#allocation5], 1 }

</bundles_post_ra>
